<compile_context>
chip_gen: v6e
topology: v6e:2x2x1
jax: 0.10.0
libtpu: 0.0.40
codegen_flags: <defaults>
</compile_context>

<pallas_src>
import jax
import jax.numpy as jnp
from jax import lax
from jax.experimental import pallas as pl
from jax.experimental.pallas import tpu as pltpu

# ----------------------------- static config -----------------------------
N_GNN = 2
DIM_GNN = 32
DIM_MLP = 32
IN_FEATURES = 16
INTERACTION_RANGE = (0.5, 5.0)
DEV_VDW_RADII_COEFF = 0.2
VDW_EPSILON_SCALE = (0.02, 0.06)
VDW_N_SHORT = 12          # realized as t6 * t6 below
VDW_N_LONG = 6
HYDROGEN_BOND_CUTOFFS = (-0.7, 0.0)
METAL_LIGAND_CUTOFFS = (-0.7, 0.0)
HYDROPHOBIC_CUTOFFS = (0.0, 1.5)
ROTOR_PENALTY = True
ATOM_FEAT = 16            # packed per-atom feature columns (pos in cols 0..2)
# Dropout layers are identity in eval mode and are omitted.


# ----------------------------- small helpers -----------------------------
def _round_up(n, m):
    return ((n + m - 1) // m) * m


def _divisor_tile(n, cap):
    """Largest multiple-of-8 divisor of n that is <= cap (n is a multiple of 8)."""
    if n <= cap:
        return n
    t = cap - (cap % 8) if cap % 8 else cap
    while t > 8 and n % t:
        t -= 8
    return t if n % t == 0 else 8


def _plan_tiles(n):
    """Pad N and pick pair-matrix tiles (sublane tile_i <= 64 so the parallel i
    axis has several blocks; lane tile_j is 128-aligned or full extent)."""
    if n <= 512:
        n_pad = max(_round_up(n, 8), 8)
        tile_j = n_pad
    else:
        n_pad = _round_up(n, 256)
        tile_j = 512 if n_pad % 512 == 0 else 256
    tile_i = _divisor_tile(n_pad, 64)
    return n_pad, tile_i, tile_j


def _vmem_limit_bytes():
    """Generation-aware VMEM request: leave headroom on v7x (64 MiB/TC), use
    most of the 128 MiB on v5e/v6e."""
    mib = 1024 * 1024
    try:
        cap = int(pltpu.get_tpu_info().vmem_capacity_bytes)
    except Exception:
        return 64 * mib        # previous known-good default
    return int(min(max(cap - 24 * mib, cap // 2), 112 * mib))


def _pad_rows(a, n_pad, value=0):
    n = a.shape[0]
    if n == n_pad:
        return a
    pad_width = [(0, n_pad - n)] + [(0, 0)] * (a.ndim - 1)
    return jnp.pad(a, pad_width, constant_values=value)


def _pad_mat(a, n_pad, value=0):
    n = a.shape[0]
    if n == n_pad:
        return a
    return jnp.pad(a, ((0, n_pad - n), (0, n_pad - n)), constant_values=value)


# ------------------------- fused GNN (embed + conv) -------------------------
def _make_gnn_kernel(n_gnn, ti_gnn, n_strips):
    bf = jnp.bfloat16

    def mm(a, b):      # MXU in bf16, f32 accumulation
        return jnp.dot(a.astype(bf), b.astype(bf), preferred_element_type=jnp.float32)

    def mm_nt(a, b):   # a: [M, K], b: [N, K] -> [M, N]
        return lax.dot_general(a.astype(bf), b.astype(bf), (((1,), (1,)), ((), ())),
                               preferred_element_type=jnp.float32)

    def kernel(*refs):
        x_ref, adj1_ref, adj2_ref, ew_ref = refs[0:4]
        off = 4
        gat_p = [refs[off + 6 * l: off + 6 * (l + 1)] for l in range(n_gnn)]
        off += 6 * n_gnn
        int_p = [refs[off + 2 * l: off + 2 * (l + 1)] for l in range(n_gnn)]
        off += 2 * n_gnn
        o_ref = refs[off]
        h_scr, ha_scr, hp_scr = refs[off + 1: off + 4]

        # self.embed: Linear(in_features, dim_gnn, bias=False)
        x = mm(x_ref[...], ew_ref[...])

        # GatedGAT layers over the intra-molecular adjacency (strip-tiled
        # attention: no full [N, N] f32 temporaries, peak extra VMEM O(TI*N)).
        for (w_ref, bw_ref, a_ref, gwx_ref, gwh_ref, gb_ref) in gat_p:
            h_scr[...] = mm(x, w_ref[...]) + bw_ref[...]
            ha_scr[...] = mm(h_scr[...], a_ref[...])

            def strip_body(s, carry):
                r0 = pl.multiple_of(s * ti_gnn, 8)
                h_s = h_scr[pl.ds(r0, ti_gnn), :]
                ha_s = ha_scr[pl.ds(r0, ti_gnn), :]
                adj_s = adj1_ref[pl.ds(r0, ti_gnn), :]           # bf16 0/1
                # symmetric attention logits for this row strip
                e = mm_nt(ha_s, h_scr[...]) + mm_nt(h_s, ha_scr[...])   # [TI, N]
                logits = jnp.where(adj_s > 0, e, -9e15)
                logits = logits - jnp.max(logits, axis=-1, keepdims=True)
                p = jnp.exp(logits)
                att = (p / jnp.sum(p, axis=-1, keepdims=True)) * adj_s.astype(jnp.float32)
                hp_scr[pl.ds(r0, ti_gnn), :] = jax.nn.relu(mm(att, h_scr[...]))
                return carry

            lax.fori_loop(0, n_strips, strip_body, 0)

            h_prime = hp_scr[...]
            gate = jax.nn.sigmoid(mm(x, gwx_ref[...]) + mm(h_prime, gwh_ref[...])
                                  + gb_ref[...])                 # [N, 1]
            x = gate * x + (1.0 - gate) * h_prime
            # Dropout == identity (eval)

        # InteractionNet layers over the inter-molecular adjacency (residual)
        for (wm_ref, bm_ref) in int_p:
            msg = mm(x, wm_ref[...]) + bm_ref[...]
            x = x + jax.nn.relu(mm(adj2_ref[...], msg))

        o_ref[...] = x

    return kernel


def gnn_call(x_in, adj_intra_bf16, adj_inter_bf16, params, ti_gnn, vmem_limit):
    N, F = x_in.shape
    D = DIM_GNN
    n_gnn = len(params["gat"])
    n_strips = N // ti_gnn

    def full(shape):
        nd = len(shape)
        return pl.BlockSpec(shape, lambda i, _nd=nd: (0,) * _nd)

    in_specs = [full((N, F)), full((N, N)), full((N, N)), full((F, D))]
    args = [x_in, adj_intra_bf16, adj_inter_bf16, params["embed_w"]]
    for lp in params["gat"]:
        in_specs += [full((D, D)), full((1, D)), full((D, D)),
                     full((D, 1)), full((D, 1)), full((1, 1))]
        args += [lp["w"], lp["bw"], lp["a"], lp["gwx"], lp["gwh"], lp["gb"]]
    for lp in params["inter"]:
        in_specs += [full((D, D)), full((1, D))]
        args += [lp["wm"], lp["bm"]]

    return pl.pallas_call(
        _make_gnn_kernel(n_gnn, ti_gnn, n_strips),
        grid=(1,),
        in_specs=in_specs,
        out_specs=full((N, D)),
        out_shape=jax.ShapeDtypeStruct((N, D), jnp.float32),
        scratch_shapes=[pltpu.VMEM((N, D), jnp.float32),    # h
                        pltpu.VMEM((N, D), jnp.float32),    # h @ A
                        pltpu.VMEM((N, D), jnp.float32)],   # h'
        compiler_params=pltpu.CompilerParams(
            dimension_semantics=("arbitrary",),
            vmem_limit_bytes=vmem_limit),
    )(*args)


# --------------------------- tiled pair-energy kernel ---------------------------
def _pair_energy_kernel(occ_ref, scal_ref, e_w2_ref, d_w2_ref,
                        xi_ref, xjT_ref, fi_ref, fjT_ref, bohj_ref,
                        e_w1i_ref, e_w1jT_ref, e_b1_ref,
                        d_w1i_ref, d_w1jT_ref, d_b1_ref,
                        e_part_ref, dvdw_ref, e_acc_ref):
    bf = jnp.bfloat16
    ti = xi_ref.shape[0]
    tj = xjT_ref.shape[1]
    m_dim = e_b1_ref.shape[1]
    i = pl.program_id(0)
    j = pl.program_id(1)

    @pl.when(j == 0)
    def _():
        e_acc_ref[...] = jnp.zeros_like(e_acc_ref)

    occupied = occ_ref[i, j] > 0

    @pl.when(occupied)
    def _():
        xi = xi_ref[...]                        # [TI, D] f32
        xjT = xjT_ref[...]                      # [D, TJ] f32 (pre-transposed)
        fi = fi_ref[...]                        # [TI, AF]
        fjT = fjT_ref[...]                      # [AF, TJ]

        lig_i, lig_j = fi[:, 8:9], fjT[8:9, :]
        bat_i, bat_j = fi[:, 9:10], fjT[9:10, :]
        don_i, don_j = fi[:, 10:11], fjT[10:11, :]
        acc_i, acc_j = fi[:, 11:12], fjT[11:12, :]
        met_i, met_j = fi[:, 12:13], fjT[12:13, :]
        hyd_i, hyd_j = fi[:, 13:14], fjT[13:14, :]
        vdw_i, vdw_j = fi[:, 14:15], fjT[14:15, :]

        # pairwise distances by direct per-coordinate differences (f32, no
        # Gram-trick cancellation even with large per-graph offsets)
        d2 = jnp.zeros((ti, tj), jnp.float32)
        for c in range(3):
            dc = fi[:, c:c + 1] - fjT[c:c + 1, :]
            d2 = d2 + dc * dc
        dist = jnp.sqrt(d2)

        # interaction mask: ligand (row) -> protein (col), same graph, in range
        in_range = jnp.logical_and(dist >= INTERACTION_RANGE[0],
                                   dist <= INTERACTION_RANGE[1])
        type_mask = jnp.where(bat_i == bat_j, lig_i * (1.0 - lig_j), 0.0)
        pmask = jnp.where(in_range, type_mask, 0.0)
        # exact reciprocal: feeds r^-12, approx error would be amplified ~12x
        rinv = pl.reciprocal(jnp.where(pmask > 0.0, dist, 1.0), approx=False)

        hbond_mask = jnp.minimum(don_i * acc_j + acc_i * don_j, 1.0)
        metal_mask = jnp.minimum(met_i * acc_j + acc_i * met_j, 1.0)
        hydro_mask = hyd_i * hyd_j
        vdw_sum = vdw_i + vdw_j

        xi_bf = xi.astype(bf)
        xjT_bf = xjT.astype(bf)

        # pair MLP heads: cat(x_i, x_j) @ W1 == x_i @ W1i + x_j @ W1j; the second
        # layer is strip-mined over 8-row strips (acc stays in vregs) with the
        # unrolled m-loop innermost, all in bf16 (result cast back to f32).
        def pair_mlp(w1i_ref, w1jT_ref, b1_ref, w2_ref, b2):
            u = (jnp.dot(xi_bf, w1i_ref[...].astype(bf),
                         preferred_element_type=jnp.float32)
                 + b1_ref[...]).astype(bf)                               # [TI, M]
            vT = jnp.dot(w1jT_ref[...].astype(bf), xjT_bf,
                         preferred_element_type=jnp.float32).astype(bf)  # [M, TJ]
            w2 = [w2_ref[m].astype(bf) for m in range(m_dim)]
            strips = []
            for r0 in range(0, ti, 8):
                rs = min(8, ti - r0)
                u_s = u[r0:r0 + rs, :]
                acc = jnp.zeros((rs, tj), bf)
                for m in range(m_dim):
                    acc = acc + w2[m] * jax.nn.relu(u_s[:, m:m + 1] + vT[m:m + 1, :])
                strips.append(acc)
            out = strips[0] if len(strips) == 1 else jnp.concatenate(strips, axis=0)
            return out.astype(jnp.float32) + b2

        dvdw = jnp.tanh(pair_mlp(d_w1i_ref, d_w1jT_ref, d_b1_ref, d_w2_ref, scal_ref[3]))
        dvdw = dvdw * DEV_VDW_RADII_COEFF
        eps = jax.nn.sigmoid(pair_mlp(e_w1i_ref, e_w1jT_ref, e_b1_ref, e_w2_ref, scal_ref[2]))
        eps = eps * (VDW_EPSILON_SCALE[1] - VDW_EPSILON_SCALE[0]) + VDW_EPSILON_SCALE[0]

        radii = vdw_sum + dvdw

        # Lennard-Jones (shared powers)
        t = jnp.minimum(radii * rinv, 20.0)
        t2 = t * t
        t6 = t2 * t2 * t2
        e_vdw = eps * (t6 * t6 - 2.0 * t6)

        # piecewise-linear potentials (shared D - R, precomputed 1/(c1 - c2))
        hb_c = scal_ref[0]
        hy_c = scal_ref[1]
        minima_hb = -(hb_c * hb_c)
        minima_hy = -(hy_c * hy_c)
        dr = dist - radii
        inv_hb = 1.0 / (HYDROGEN_BOND_CUTOFFS[0] - HYDROGEN_BOND_CUTOFFS[1])
        frac_hb = jnp.clip((dr - HYDROGEN_BOND_CUTOFFS[1]) * inv_hb, 0.0, 1.0)
        if METAL_LIGAND_CUTOFFS == HYDROGEN_BOND_CUTOFFS:
            frac_ml = frac_hb
        else:
            inv_ml = 1.0 / (METAL_LIGAND_CUTOFFS[0] - METAL_LIGAND_CUTOFFS[1])
            frac_ml = jnp.clip((dr - METAL_LIGAND_CUTOFFS[1]) * inv_ml, 0.0, 1.0)
        inv_hp = 1.0 / (HYDROPHOBIC_CUTOFFS[0] - HYDROPHOBIC_CUTOFFS[1])
        frac_hp = jnp.clip((dr - HYDROPHOBIC_CUTOFFS[1]) * inv_hp, 0.0, 1.0)
        # NOTE: metal-ligand term uses the hbond coefficient, as in the reference.
        e_hb = minima_hb * frac_hb * hbond_mask
        e_ml = minima_hb * frac_ml * metal_mask
        e_hp = minima_hy * frac_hp * hydro_mask

        # per-graph scatter: column sums + ONE matmul against one-hot(batch_j).
        # (batch_i == batch_j on every unmasked pair, so scattering by j == by i.)
        ev = e_vdw * pmask
        eh = e_hb * pmask
        em = e_ml * pmask
        ep = e_hp * pmask
        rows = jnp.concatenate(
            [jnp.sum(ev, axis=0, keepdims=True),
             jnp.sum(eh, axis=0, keepdims=True),
             jnp.sum(em, axis=0, keepdims=True),
             jnp.sum(ep, axis=0, keepdims=True),
             jnp.zeros((4, tj), jnp.float32)], axis=0)               # [8, TJ]
        contrib = jnp.dot(rows, bohj_ref[...],
                          preferred_element_type=jnp.float32)        # [8, GP]
        e_acc_ref[...] += contrib

        dvdw_ref[...] = dvdw

    @pl.when(jnp.logical_not(occupied))
    def _():
        dvdw_ref[...] = jnp.zeros_like(dvdw_ref)

    # write the per-i-block energy partials once, at the last j step
    @pl.when(j == pl.num_programs(1) - 1)
    def _():
        e_part_ref[...] = e_acc_ref[...]


def pair_energy_call(occ, scalars, x, xT, feats, featsT, bohj, eps_p, dvdw_p,
                     tile_i, tile_j, vmem_limit):
    N, D = x.shape
    AF = feats.shape[1]
    GP = bohj.shape[1]
    M = eps_p["w1i"].shape[1]
    assert N % tile_i == 0 and N % tile_j == 0
    ni, nj = N // tile_i, N // tile_j

    def smem_full(shape):
        nd = len(shape)
        return pl.BlockSpec(shape, lambda i, j, _nd=nd: (0,) * _nd,
                            memory_space=pltpu.MemorySpace.SMEM)

    def vmem_full(shape):
        nd = len(shape)
        return pl.BlockSpec(shape, lambda i, j, _nd=nd: (0,) * _nd)

    in_specs = [
        smem_full((ni, nj)),                                 # block occupancy flags
        smem_full((4,)), smem_full((M,)), smem_full((M,)),
        pl.BlockSpec((tile_i, D), lambda i, j: (i, 0)),      # x rows (i block)
        pl.BlockSpec((D, tile_j), lambda i, j: (0, j)),      # x^T cols (j block)
        pl.BlockSpec((tile_i, AF), lambda i, j: (i, 0)),     # atom feats (i block)
        pl.BlockSpec((AF, tile_j), lambda i, j: (0, j)),     # atom feats^T (j block)
        pl.BlockSpec((tile_j, GP), lambda i, j: (j, 0)),     # one-hot(batch) (j block)
        vmem_full((D, M)), vmem_full((M, D)), vmem_full((1, M)),
        vmem_full((D, M)), vmem_full((M, D)), vmem_full((1, M)),
    ]
    out_specs = (
        pl.BlockSpec((None, 8, GP), lambda i, j: (i, 0, 0)),  # per-i-block energies
        pl.BlockSpec((tile_i, tile_j), lambda i, j: (i, j)),  # dense dvdw
    )
    out_shape = (
        jax.ShapeDtypeStruct((ni, 8, GP), jnp.float32),
        jax.ShapeDtypeStruct((N, N), jnp.float32),
    )
    return pl.pallas_call(
        _pair_energy_kernel,
        grid=(ni, nj),
        in_specs=in_specs,
        out_specs=out_specs,
        out_shape=out_shape,
        scratch_shapes=[pltpu.VMEM((8, GP), jnp.float32)],    # energy accumulator
        compiler_params=pltpu.CompilerParams(
            dimension_semantics=("parallel", "arbitrary"),
            vmem_limit_bytes=vmem_limit),
    )(occ, scalars, eps_p["w2"], dvdw_p["w2"], x, xT, feats, featsT, bohj,
      eps_p["w1i"], eps_p["w1jT"], eps_p["b1"],
      dvdw_p["w1i"], dvdw_p["w1jT"], dvdw_p["b1"])


# ------------------------------ model glue ------------------------------
def init_params(key):
    ks = list(jax.random.split(key, 64))
    it = iter(ks)

    def nrm(shape, scale=0.1):
        return (scale * jax.random.normal(next(it), shape)).astype(jnp.float32)

    params = {"embed_w": nrm((IN_FEATURES, DIM_GNN)), "gat": [], "inter": []}
    for _ in range(N_GNN):
        params["gat"].append(dict(
            w=nrm((DIM_GNN, DIM_GNN)), bw=nrm((1, DIM_GNN)), a=nrm((DIM_GNN, DIM_GNN)),
            gwx=nrm((DIM_GNN, 1)), gwh=nrm((DIM_GNN, 1)), gb=nrm((1, 1))))
    for _ in range(N_GNN):
        params["inter"].append(dict(wm=nrm((DIM_GNN, DIM_GNN)), bm=nrm((1, DIM_GNN))))

    def mlp_head():
        # Linear(2D, M) split into the x_i / x_j halves; second Linear(M, 1)
        # kept as an SMEM vector w2 + scalar b2.
        return dict(w1i=nrm((DIM_GNN, DIM_MLP)), w1jT=nrm((DIM_MLP, DIM_GNN)),
                    b1=nrm((1, DIM_MLP)), w2=nrm((DIM_MLP,)), b2=nrm(()))

    params["vdw_eps"] = mlp_head()
    params["dvdw"] = mlp_head()
    params["hbond_coeff"] = jnp.float32(1.0)
    params["hydrophobic_coeff"] = jnp.float32(0.5)
    params["rotor_coeff"] = jnp.float32(0.5)
    return params


def pignet_forward(params, sample, num_graphs, tile_i=None, tile_j=None):
    f32 = lambda a: jnp.asarray(a, jnp.float32)
    N0 = sample["x"].shape[0]
    n_pad, dti, dtj = _plan_tiles(N0)
    tile_i = dti if tile_i is None else tile_i
    tile_j = dtj if tile_j is None else tile_j
    assert n_pad % tile_i == 0 and n_pad % tile_j == 0
    assert tile_i % 8 == 0 or tile_i == n_pad
    assert tile_j % 128 == 0 or tile_j == n_pad
    vmem_limit = _vmem_limit_bytes()

    # ---- fused embed + GatedGAT x N + InteractionNet x N (one pallas_call) ----
    x_in = _pad_rows(f32(sample["x"]), n_pad)
    # adjacencies are 0/1 -> exact in bf16 (halves DMA + VMEM of the GNN call)
    adj1 = _pad_mat(f32(sample["adj_intra"]), n_pad).astype(jnp.bfloat16)
    adj2 = _pad_mat(f32(sample["adj_inter"]), n_pad).astype(jnp.bfloat16)
    ti_gnn = _divisor_tile(n_pad, 256)
    x = gnn_call(x_in, adj1, adj2, params, ti_gnn, vmem_limit)        # [n_pad, D]

    # ---- O(N) glue: pack per-atom feature columns; all [N, N] masks are built
    #      in-kernel as outer products ----
    pos = _pad_rows(f32(sample["pos"]), n_pad)
    batch = _pad_rows(jnp.asarray(sample["batch"], jnp.int32), n_pad, value=-1)
    lig = _pad_rows(f32(sample["is_ligand"]), n_pad)
    don = _pad_rows(f32(sample["is_h_donor"]), n_pad)
    acc = _pad_rows(f32(sample["is_h_acceptor"]), n_pad)
    met = _pad_rows(f32(sample["is_metal"]), n_pad)
    hyd = _pad_rows(f32(sample["is_hydrophobic"]), n_pad)
    vdw = _pad_rows(f32(sample["vdw_radii"]), n_pad)

    feats = jnp.zeros((n_pad, ATOM_FEAT), jnp.float32)
    feats = feats.at[:, 0:3].set(pos)
    feats = feats.at[:, 8].set(lig)
    feats = feats.at[:, 9].set(batch.astype(jnp.float32))
    feats = feats.at[:, 10].set(don)
    feats = feats.at[:, 11].set(acc)
    feats = feats.at[:, 12].set(met)
    feats = feats.at[:, 13].set(hyd)
    feats = feats.at[:, 14].set(vdw)
    featsT = feats.T
    xT = x.T

    GP = _round_up(max(num_graphs, 1), 128)                  # lane-aligned graph dim
    bohj = (batch[:, None] == jnp.arange(GP, dtype=jnp.int32)[None, :]
            ).astype(jnp.float32)                            # [n_pad, GP]

    # block-level occupancy: any ligand atom in the i strip AND any same-graph
    # protein atom in the j strip -> skip fully masked tiles in-kernel.
    ni, nj = n_pad // tile_i, n_pad // tile_j
    lig_b = lig > 0.5
    goh = batch[:, None] == jnp.arange(num_graphs, dtype=jnp.int32)[None, :]
    lig_blk = jnp.any((lig_b[:, None] & goh).reshape(ni, tile_i, num_graphs), axis=1)
    prot_blk = jnp.any(((~lig_b)[:, None] & goh).reshape(nj, tile_j, num_graphs), axis=1)
    occ = jnp.any(lig_blk[:, None, :] & prot_blk[None, :, :], axis=-1).astype(jnp.int32)
    # TODO(synk): further win possible by compacting ligand atoms so the i grid
    # axis only spans ligand-row blocks.

    eps_p, dvdw_p = params["vdw_eps"], params["dvdw"]
    scalars = jnp.stack([params["hbond_coeff"], params["hydrophobic_coeff"],
                         eps_p["b2"], dvdw_p["b2"]]).astype(jnp.float32)

    e_part, dvdw_dense = pair_energy_call(
        occ, scalars, x, xT, feats, featsT, bohj, eps_p, dvdw_p,
        tile_i, tile_j, vmem_limit)

    energies = jnp.sum(e_part, axis=0)[:4, :num_graphs].T            # [G, 4]
    if ROTOR_PENALTY:
        penalty = 1.0 + params["rotor_coeff"] ** 2 * f32(sample["rotor"])   # [G, 1]
        energies = energies / penalty

    # pair mask recomputed with cheap elementwise JAX (dropped from the kernel
    # outputs per perf review; distances by direct differences -> no cancellation).
    pos0 = f32(sample["pos"])
    batch0 = jnp.asarray(sample["batch"], jnp.int32)
    lig0 = jnp.asarray(sample["is_ligand"]) > 0
    d0 = jnp.sqrt(jnp.sum((pos0[:, None, :] - pos0[None, :, :]) ** 2, -1))
    pmask = ((batch0[:, None] == batch0[None, :]) & lig0[:, None] & (~lig0)[None, :]
             & (d0 >= INTERACTION_RANGE[0]) & (d0 <= INTERACTION_RANGE[1])
             ).astype(jnp.float32)

    # TODO(synk): PyTorch returns dvdw_radii only for the boolean-selected edges
    # (dynamic shape); here the dense [N, N] dvdw matrix + pair_mask is returned.
    return energies, dvdw_dense[:N0, :N0], pmask


# --------------------------------- main ----------------------------------
if __name__ == "__main__":
    key = jax.random.PRNGKey(0)
    pkey, dkey = jax.random.split(key)
    params = init_params(pkey)

    G = 2                 # graphs in the batch
    per_graph = 8         # 4 ligand + 4 protein atoms each
    N = G * per_graph

    ks = jax.random.split(dkey, 4)
    x_in = jax.random.normal(ks[0], (N, IN_FEATURES), jnp.float32)
    base = jnp.repeat(jnp.arange(G, dtype=jnp.float32)[:, None] * 100.0, per_graph, axis=0)
    pos = base + 2.0 * jax.random.normal(ks[1], (N, 3), jnp.float32)

    is_ligand = jnp.tile(jnp.array([1, 1, 1, 1, 0, 0, 0, 0], jnp.int32), G)
    batch = jnp.repeat(jnp.arange(G, dtype=jnp.int32), per_graph)
    is_metal = (jax.random.uniform(ks[2], (N,)) < 0.1).astype(jnp.int32) * (1 - is_ligand)
    rnd = jax.random.uniform(ks[3], (N, 3))
    is_h_donor = (rnd[:, 0] < 0.4).astype(jnp.int32)
    is_h_acceptor = (rnd[:, 1] < 0.4).astype(jnp.int32)
    is_hydrophobic = (rnd[:, 2] < 0.5).astype(jnp.int32)
    vdw_radii = (1.5 + 0.4 * jax.random.uniform(jax.random.PRNGKey(7), (N,))).astype(jnp.float32)
    rotor = jnp.array([[3.0], [5.0]], jnp.float32)

    # adjacency construction (input data prep, plain JAX)
    idx = jnp.arange(N)
    same_graph_b = batch[:, None] == batch[None, :]
    same_mol = (is_ligand[:, None] == is_ligand[None, :]) & same_graph_b
    chain = jnp.abs(idx[:, None] - idx[None, :]) <= 1
    adj_intra = (same_mol & chain).astype(jnp.float32)
    d_np = jnp.sqrt(jnp.sum((pos[:, None, :] - pos[None, :, :]) ** 2, -1))
    cross = (is_ligand[:, None] != is_ligand[None, :]) & same_graph_b
    adj_inter = ((cross & (d_np < 5.0)) | (idx[:, None] == idx[None, :])).astype(jnp.float32)

    sample = dict(x=x_in, pos=pos, adj_intra=adj_intra, adj_inter=adj_inter,
                  is_ligand=is_ligand, is_metal=is_metal, is_h_donor=is_h_donor,
                  is_h_acceptor=is_h_acceptor, is_hydrophobic=is_hydrophobic,
                  vdw_radii=vdw_radii, batch=batch, rotor=rotor)

    # tile_i=8 exercises a real (2, 1) pipelined grid (and megacore split) at small N.
    energies, dvdw, pmask = pignet_forward(params, sample, num_graphs=G,
                                           tile_i=8, tile_j=N)
    jax.block_until_ready((energies, dvdw, pmask))
    assert energies.shape == (G, 4)
    assert dvdw.shape == (N, N) and pmask.shape == (N, N)
    assert bool(jnp.all(jnp.isfinite(energies)))
    print("KERNEL_OK")
</pallas_src>

<mosaic_0001>
module attributes {stable_mosaic.version = 11 : i64} {
  func.func @kernel(%arg0: i32, %arg1: memref<16x16xf32, #tpu.memory_space<vmem>>, %arg2: memref<16x16xbf16, #tpu.memory_space<vmem>>, %arg3: memref<16x16xbf16, #tpu.memory_space<vmem>>, %arg4: memref<16x32xf32, #tpu.memory_space<vmem>>, %arg5: memref<32x32xf32, #tpu.memory_space<vmem>>, %arg6: memref<1x32xf32, #tpu.memory_space<vmem>>, %arg7: memref<32x32xf32, #tpu.memory_space<vmem>>, %arg8: memref<32x1xf32, #tpu.memory_space<vmem>>, %arg9: memref<32x1xf32, #tpu.memory_space<vmem>>, %arg10: memref<1x1xf32, #tpu.memory_space<vmem>>, %arg11: memref<32x32xf32, #tpu.memory_space<vmem>>, %arg12: memref<1x32xf32, #tpu.memory_space<vmem>>, %arg13: memref<32x32xf32, #tpu.memory_space<vmem>>, %arg14: memref<32x1xf32, #tpu.memory_space<vmem>>, %arg15: memref<32x1xf32, #tpu.memory_space<vmem>>, %arg16: memref<1x1xf32, #tpu.memory_space<vmem>>, %arg17: memref<32x32xf32, #tpu.memory_space<vmem>>, %arg18: memref<1x32xf32, #tpu.memory_space<vmem>>, %arg19: memref<32x32xf32, #tpu.memory_space<vmem>>, %arg20: memref<1x32xf32, #tpu.memory_space<vmem>>, %arg21: memref<16x32xf32, #tpu.memory_space<vmem>>, %arg22: memref<16x32xf32, #tpu.memory_space<vmem>>, %arg23: memref<16x32xf32, #tpu.memory_space<vmem>>, %arg24: memref<16x32xf32, #tpu.memory_space<vmem>>) attributes {dimension_semantics = [#tpu.dimension_semantics<arbitrary>], iteration_bounds = array<i64: 1>, scalar_prefetch = 0 : i64, scratch_operands = 3 : i64, tpu.core_type = #tpu.core_type<tc>, window_params = [{pipeline_mode = #tpu.pipeline_mode<synchronous>, transform_indices = @transform_0, window_bounds = array<i64: 16, 16>}, {pipeline_mode = #tpu.pipeline_mode<synchronous>, transform_indices = @transform_1, window_bounds = array<i64: 16, 16>}, {pipeline_mode = #tpu.pipeline_mode<synchronous>, transform_indices = @transform_2, window_bounds = array<i64: 16, 16>}, {pipeline_mode = #tpu.pipeline_mode<synchronous>, transform_indices = @transform_3, window_bounds = array<i64: 16, 32>}, {pipeline_mode = #tpu.pipeline_mode<synchronous>, transform_indices = @transform_4, window_bounds = array<i64: 32, 32>}, {pipeline_mode = #tpu.pipeline_mode<synchronous>, transform_indices = @transform_5, window_bounds = array<i64: 1, 32>}, {pipeline_mode = #tpu.pipeline_mode<synchronous>, transform_indices = @transform_6, window_bounds = array<i64: 32, 32>}, {pipeline_mode = #tpu.pipeline_mode<synchronous>, transform_indices = @transform_7, window_bounds = array<i64: 32, 1>}, {pipeline_mode = #tpu.pipeline_mode<synchronous>, transform_indices = @transform_8, window_bounds = array<i64: 32, 1>}, {pipeline_mode = #tpu.pipeline_mode<synchronous>, transform_indices = @transform_9, window_bounds = array<i64: 1, 1>}, {pipeline_mode = #tpu.pipeline_mode<synchronous>, transform_indices = @transform_10, window_bounds = array<i64: 32, 32>}, {pipeline_mode = #tpu.pipeline_mode<synchronous>, transform_indices = @transform_11, window_bounds = array<i64: 1, 32>}, {pipeline_mode = #tpu.pipeline_mode<synchronous>, transform_indices = @transform_12, window_bounds = array<i64: 32, 32>}, {pipeline_mode = #tpu.pipeline_mode<synchronous>, transform_indices = @transform_13, window_bounds = array<i64: 32, 1>}, {pipeline_mode = #tpu.pipeline_mode<synchronous>, transform_indices = @transform_14, window_bounds = array<i64: 32, 1>}, {pipeline_mode = #tpu.pipeline_mode<synchronous>, transform_indices = @transform_15, window_bounds = array<i64: 1, 1>}, {pipeline_mode = #tpu.pipeline_mode<synchronous>, transform_indices = @transform_16, window_bounds = array<i64: 32, 32>}, {pipeline_mode = #tpu.pipeline_mode<synchronous>, transform_indices = @transform_17, window_bounds = array<i64: 1, 32>}, {pipeline_mode = #tpu.pipeline_mode<synchronous>, transform_indices = @transform_18, window_bounds = array<i64: 32, 32>}, {pipeline_mode = #tpu.pipeline_mode<synchronous>, transform_indices = @transform_19, window_bounds = array<i64: 1, 32>}, {pipeline_mode = #tpu.pipeline_mode<synchronous>, transform_indices = @transform_20, window_bounds = array<i64: 16, 32>}]} {
    %c0 = arith.constant 0 : index
    %c0_0 = arith.constant 0 : index
    %0 = vector.load %arg1[%c0, %c0_0] : memref<16x16xf32, #tpu.memory_space<vmem>>, vector<16x16xf32>
    %c0_1 = arith.constant 0 : index
    %c0_2 = arith.constant 0 : index
    %1 = vector.load %arg4[%c0_1, %c0_2] : memref<16x32xf32, #tpu.memory_space<vmem>>, vector<16x32xf32>
    %2 = arith.truncf %0 : vector<16x16xf32> to vector<16x16xbf16>
    %3 = arith.truncf %1 : vector<16x32xf32> to vector<16x32xbf16>
    %cst = arith.constant dense<0.000000e+00> : vector<16x32xf32>
    %4 = tpu.matmul %2, %3, %cst {dimension_numbers = #tpu.dot_dimension_numbers<[1], [0], [0], [1], [0, 0, 1, 1], [], []>} : vector<16x16xbf16>, vector<16x32xbf16>, vector<16x32xf32> -> vector<16x32xf32>
    %c0_3 = arith.constant 0 : index
    %c0_4 = arith.constant 0 : index
    %5 = vector.load %arg5[%c0_3, %c0_4] : memref<32x32xf32, #tpu.memory_space<vmem>>, vector<32x32xf32>
    %6 = arith.truncf %4 : vector<16x32xf32> to vector<16x32xbf16>
    %7 = arith.truncf %5 : vector<32x32xf32> to vector<32x32xbf16>
    %cst_5 = arith.constant dense<0.000000e+00> : vector<16x32xf32>
    %8 = tpu.matmul %6, %7, %cst_5 {dimension_numbers = #tpu.dot_dimension_numbers<[1], [0], [0], [1], [0, 0, 1, 1], [], []>} : vector<16x32xbf16>, vector<32x32xbf16>, vector<16x32xf32> -> vector<16x32xf32>
    %c0_6 = arith.constant 0 : index
    %c0_7 = arith.constant 0 : index
    %9 = vector.load %arg6[%c0_6, %c0_7] : memref<1x32xf32, #tpu.memory_space<vmem>>, vector<1x32xf32>
    %10 = vector.broadcast %9 : vector<1x32xf32> to vector<16x32xf32>
    %11 = arith.addf %8, %10 : vector<16x32xf32>
    %c0_8 = arith.constant 0 : index
    %c0_9 = arith.constant 0 : index
    %12 = vector.load %arg22[%c0_8, %c0_9] : memref<16x32xf32, #tpu.memory_space<vmem>>, vector<16x32xf32>
    tpu.vector_store %arg22[%c0_8, %c0_9], %11 {strides = array<i32>} : memref<16x32xf32, #tpu.memory_space<vmem>>, vector<16x32xf32>,
    %c0_10 = arith.constant 0 : index
    %c0_11 = arith.constant 0 : index
    %13 = vector.load %arg22[%c0_10, %c0_11] : memref<16x32xf32, #tpu.memory_space<vmem>>, vector<16x32xf32>
    %c0_12 = arith.constant 0 : index
    %c0_13 = arith.constant 0 : index
    %14 = vector.load %arg7[%c0_12, %c0_13] : memref<32x32xf32, #tpu.memory_space<vmem>>, vector<32x32xf32>
    %15 = arith.truncf %13 : vector<16x32xf32> to vector<16x32xbf16>
    %16 = arith.truncf %14 : vector<32x32xf32> to vector<32x32xbf16>
    %cst_14 = arith.constant dense<0.000000e+00> : vector<16x32xf32>
    %17 = tpu.matmul %15, %16, %cst_14 {dimension_numbers = #tpu.dot_dimension_numbers<[1], [0], [0], [1], [0, 0, 1, 1], [], []>} : vector<16x32xbf16>, vector<32x32xbf16>, vector<16x32xf32> -> vector<16x32xf32>
    %c0_15 = arith.constant 0 : index
    %c0_16 = arith.constant 0 : index
    %18 = vector.load %arg23[%c0_15, %c0_16] : memref<16x32xf32, #tpu.memory_space<vmem>>, vector<16x32xf32>
    tpu.vector_store %arg23[%c0_15, %c0_16], %17 {strides = array<i32>} : memref<16x32xf32, #tpu.memory_space<vmem>>, vector<16x32xf32>,
    %c0_i32 = arith.constant 0 : i32
    %c16_i32 = arith.constant 16 : i32
    %19 = arith.muli %c0_i32, %c16_i32 : i32
    %20 = tpu.assume_multiple %19, 8 : i32
    %21 = arith.index_cast %20 : i32 to index
    %c0_17 = arith.constant 0 : index
    %22 = vector.load %arg22[%21, %c0_17] : memref<16x32xf32, #tpu.memory_space<vmem>>, vector<16x32xf32>
    %23 = arith.index_cast %20 : i32 to index
    %c0_18 = arith.constant 0 : index
    %24 = vector.load %arg23[%23, %c0_18] : memref<16x32xf32, #tpu.memory_space<vmem>>, vector<16x32xf32>
    %25 = arith.index_cast %20 : i32 to index
    %c0_19 = arith.constant 0 : index
    %26 = vector.load %arg2[%25, %c0_19] : memref<16x16xbf16, #tpu.memory_space<vmem>>, vector<16x16xbf16>
    %c0_20 = arith.constant 0 : index
    %c0_21 = arith.constant 0 : index
    %27 = vector.load %arg22[%c0_20, %c0_21] : memref<16x32xf32, #tpu.memory_space<vmem>>, vector<16x32xf32>
    %28 = arith.truncf %24 : vector<16x32xf32> to vector<16x32xbf16>
    %29 = arith.truncf %27 : vector<16x32xf32> to vector<16x32xbf16>
    %cst_22 = arith.constant dense<0.000000e+00> : vector<16x16xf32>
    %30 = tpu.matmul %28, %29, %cst_22 {dimension_numbers = #tpu.dot_dimension_numbers<[1], [1], [0], [0], [0, 0, 1, 0], [], []>} : vector<16x32xbf16>, vector<16x32xbf16>, vector<16x16xf32> -> vector<16x16xf32>
    %c0_23 = arith.constant 0 : index
    %c0_24 = arith.constant 0 : index
    %31 = vector.load %arg23[%c0_23, %c0_24] : memref<16x32xf32, #tpu.memory_space<vmem>>, vector<16x32xf32>
    %32 = arith.truncf %22 : vector<16x32xf32> to vector<16x32xbf16>
    %33 = arith.truncf %31 : vector<16x32xf32> to vector<16x32xbf16>
    %cst_25 = arith.constant dense<0.000000e+00> : vector<16x16xf32>
    %34 = tpu.matmul %32, %33, %cst_25 {dimension_numbers = #tpu.dot_dimension_numbers<[1], [1], [0], [0], [0, 0, 1, 0], [], []>} : vector<16x32xbf16>, vector<16x32xbf16>, vector<16x16xf32> -> vector<16x16xf32>
    %35 = arith.addf %30, %34 : vector<16x16xf32>
    %cst_26 = arith.constant 0.000000e+00 : bf16
    %36 = vector.broadcast %cst_26 : bf16 to vector<16x16xbf16>
    %37 = arith.cmpf ogt, %26, %36 : vector<16x16xbf16>
    %cst_27 = arith.constant -9.000000e+15 : f32
    %38 = vector.broadcast %cst_27 : f32 to vector<16x16xf32>
    %39 = arith.select %37, %35, %38 : vector<16x16xi1>, vector<16x16xf32>
    %cst_28 = arith.constant dense<0xFF800000> : vector<16xf32>
    %40 = vector.multi_reduction <maximumf>, %39, %cst_28 [1] : vector<16x16xf32> to vector<16xf32>
    %41 = vector.shape_cast %40 : vector<16xf32> to vector<16x1xf32>
    %42 = vector.broadcast %41 : vector<16x1xf32> to vector<16x16xf32>
    %43 = arith.subf %39, %42 : vector<16x16xf32>
    %44 = math.exp %43 : vector<16x16xf32>
    %cst_29 = arith.constant dense<0.000000e+00> : vector<16xf32>
    %45 = vector.multi_reduction <add>, %44, %cst_29 [1] : vector<16x16xf32> to vector<16xf32>
    %46 = vector.shape_cast %45 : vector<16xf32> to vector<16x1xf32>
    %47 = vector.broadcast %46 : vector<16x1xf32> to vector<16x16xf32>
    %48 = arith.divf %44, %47 : vector<16x16xf32>
    %49 = arith.extf %26 : vector<16x16xbf16> to vector<16x16xf32>
    %50 = arith.mulf %48, %49 : vector<16x16xf32>
    %c0_30 = arith.constant 0 : index
    %c0_31 = arith.constant 0 : index
    %51 = vector.load %arg22[%c0_30, %c0_31] : memref<16x32xf32, #tpu.memory_space<vmem>>, vector<16x32xf32>
    %52 = arith.truncf %50 : vector<16x16xf32> to vector<16x16xbf16>
    %53 = arith.truncf %51 : vector<16x32xf32> to vector<16x32xbf16>
    %cst_32 = arith.constant dense<0.000000e+00> : vector<16x32xf32>
    %54 = tpu.matmul %52, %53, %cst_32 {dimension_numbers = #tpu.dot_dimension_numbers<[1], [0], [0], [1], [0, 0, 1, 1], [], []>} : vector<16x16xbf16>, vector<16x32xbf16>, vector<16x32xf32> -> vector<16x32xf32>
    %cst_33 = arith.constant 0.000000e+00 : f32
    %55 = vector.broadcast %cst_33 : f32 to vector<16x32xf32>
    %56 = arith.maximumf %54, %55 : vector<16x32xf32>
    %57 = arith.index_cast %20 : i32 to index
    %c0_34 = arith.constant 0 : index
    %58 = vector.load %arg24[%57, %c0_34] : memref<16x32xf32, #tpu.memory_space<vmem>>, vector<16x32xf32>
    tpu.vector_store %arg24[%57, %c0_34], %56 {strides = array<i32>} : memref<16x32xf32, #tpu.memory_space<vmem>>, vector<16x32xf32>,
    %c1_i32 = arith.constant 1 : i32
    %c0_35 = arith.constant 0 : index
    %c0_36 = arith.constant 0 : index
    %59 = vector.load %arg24[%c0_35, %c0_36] : memref<16x32xf32, #tpu.memory_space<vmem>>, vector<16x32xf32>
    %c0_37 = arith.constant 0 : index
    %c0_38 = arith.constant 0 : index
    %60 = vector.load %arg8[%c0_37, %c0_38] : memref<32x1xf32, #tpu.memory_space<vmem>>, vector<32x1xf32>
    %61 = arith.truncf %4 : vector<16x32xf32> to vector<16x32xbf16>
    %62 = arith.truncf %60 : vector<32x1xf32> to vector<32x1xbf16>
    %cst_39 = arith.constant dense<0.000000e+00> : vector<16x1xf32>
    %63 = tpu.matmul %61, %62, %cst_39 {dimension_numbers = #tpu.dot_dimension_numbers<[1], [0], [0], [1], [0, 0, 1, 1], [], []>} : vector<16x32xbf16>, vector<32x1xbf16>, vector<16x1xf32> -> vector<16x1xf32>
    %c0_40 = arith.constant 0 : index
    %c0_41 = arith.constant 0 : index
    %64 = vector.load %arg9[%c0_40, %c0_41] : memref<32x1xf32, #tpu.memory_space<vmem>>, vector<32x1xf32>
    %65 = arith.truncf %59 : vector<16x32xf32> to vector<16x32xbf16>
    %66 = arith.truncf %64 : vector<32x1xf32> to vector<32x1xbf16>
    %cst_42 = arith.constant dense<0.000000e+00> : vector<16x1xf32>
    %67 = tpu.matmul %65, %66, %cst_42 {dimension_numbers = #tpu.dot_dimension_numbers<[1], [0], [0], [1], [0, 0, 1, 1], [], []>} : vector<16x32xbf16>, vector<32x1xbf16>, vector<16x1xf32> -> vector<16x1xf32>
    %68 = arith.addf %63, %67 : vector<16x1xf32>
    %c0_43 = arith.constant 0 : index
    %c0_44 = arith.constant 0 : index
    %69 = vector.load %arg10[%c0_43, %c0_44] : memref<1x1xf32, #tpu.memory_space<vmem>>, vector<1x1xf32>
    %70 = vector.broadcast %69 : vector<1x1xf32> to vector<16x1xf32>
    %71 = arith.addf %68, %70 : vector<16x1xf32>
    %72 = arith.negf %71 : vector<16x1xf32>
    %73 = math.exp %72 : vector<16x1xf32>
    %cst_45 = arith.constant 1.000000e+00 : f32
    %74 = vector.broadcast %cst_45 : f32 to vector<16x1xf32>
    %75 = arith.addf %74, %73 : vector<16x1xf32>
    %76 = arith.divf %74, %75 : vector<16x1xf32>
    %77 = vector.broadcast %76 : vector<16x1xf32> to vector<16x32xf32>
    %78 = arith.mulf %77, %4 : vector<16x32xf32>
    %cst_46 = arith.constant 1.000000e+00 : f32
    %79 = vector.broadcast %cst_46 : f32 to vector<16x1xf32>
    %80 = arith.subf %79, %76 : vector<16x1xf32>
    %81 = vector.broadcast %80 : vector<16x1xf32> to vector<16x32xf32>
    %82 = arith.mulf %81, %59 : vector<16x32xf32>
    %83 = arith.addf %78, %82 : vector<16x32xf32>
    %c0_47 = arith.constant 0 : index
    %c0_48 = arith.constant 0 : index
    %84 = vector.load %arg11[%c0_47, %c0_48] : memref<32x32xf32, #tpu.memory_space<vmem>>, vector<32x32xf32>
    %85 = arith.truncf %83 : vector<16x32xf32> to vector<16x32xbf16>
    %86 = arith.truncf %84 : vector<32x32xf32> to vector<32x32xbf16>
    %cst_49 = arith.constant dense<0.000000e+00> : vector<16x32xf32>
    %87 = tpu.matmul %85, %86, %cst_49 {dimension_numbers = #tpu.dot_dimension_numbers<[1], [0], [0], [1], [0, 0, 1, 1], [], []>} : vector<16x32xbf16>, vector<32x32xbf16>, vector<16x32xf32> -> vector<16x32xf32>
    %c0_50 = arith.constant 0 : index
    %c0_51 = arith.constant 0 : index
    %88 = vector.load %arg12[%c0_50, %c0_51] : memref<1x32xf32, #tpu.memory_space<vmem>>, vector<1x32xf32>
    %89 = vector.broadcast %88 : vector<1x32xf32> to vector<16x32xf32>
    %90 = arith.addf %87, %89 : vector<16x32xf32>
    %c0_52 = arith.constant 0 : index
    %c0_53 = arith.constant 0 : index
    %91 = vector.load %arg22[%c0_52, %c0_53] : memref<16x32xf32, #tpu.memory_space<vmem>>, vector<16x32xf32>
    tpu.vector_store %arg22[%c0_52, %c0_53], %90 {strides = array<i32>} : memref<16x32xf32, #tpu.memory_space<vmem>>, vector<16x32xf32>,
    %c0_54 = arith.constant 0 : index
    %c0_55 = arith.constant 0 : index
    %92 = vector.load %arg22[%c0_54, %c0_55] : memref<16x32xf32, #tpu.memory_space<vmem>>, vector<16x32xf32>
    %c0_56 = arith.constant 0 : index
    %c0_57 = arith.constant 0 : index
    %93 = vector.load %arg13[%c0_56, %c0_57] : memref<32x32xf32, #tpu.memory_space<vmem>>, vector<32x32xf32>
    %94 = arith.truncf %92 : vector<16x32xf32> to vector<16x32xbf16>
    %95 = arith.truncf %93 : vector<32x32xf32> to vector<32x32xbf16>
    %cst_58 = arith.constant dense<0.000000e+00> : vector<16x32xf32>
    %96 = tpu.matmul %94, %95, %cst_58 {dimension_numbers = #tpu.dot_dimension_numbers<[1], [0], [0], [1], [0, 0, 1, 1], [], []>} : vector<16x32xbf16>, vector<32x32xbf16>, vector<16x32xf32> -> vector<16x32xf32>
    %c0_59 = arith.constant 0 : index
    %c0_60 = arith.constant 0 : index
    %97 = vector.load %arg23[%c0_59, %c0_60] : memref<16x32xf32, #tpu.memory_space<vmem>>, vector<16x32xf32>
    tpu.vector_store %arg23[%c0_59, %c0_60], %96 {strides = array<i32>} : memref<16x32xf32, #tpu.memory_space<vmem>>, vector<16x32xf32>,
    %c0_i32_61 = arith.constant 0 : i32
    %c16_i32_62 = arith.constant 16 : i32
    %98 = arith.muli %c0_i32_61, %c16_i32_62 : i32
    %99 = tpu.assume_multiple %98, 8 : i32
    %100 = arith.index_cast %99 : i32 to index
    %c0_63 = arith.constant 0 : index
    %101 = vector.load %arg22[%100, %c0_63] : memref<16x32xf32, #tpu.memory_space<vmem>>, vector<16x32xf32>
    %102 = arith.index_cast %99 : i32 to index
    %c0_64 = arith.constant 0 : index
    %103 = vector.load %arg23[%102, %c0_64] : memref<16x32xf32, #tpu.memory_space<vmem>>, vector<16x32xf32>
    %104 = arith.index_cast %99 : i32 to index
    %c0_65 = arith.constant 0 : index
    %105 = vector.load %arg2[%104, %c0_65] : memref<16x16xbf16, #tpu.memory_space<vmem>>, vector<16x16xbf16>
    %c0_66 = arith.constant 0 : index
    %c0_67 = arith.constant 0 : index
    %106 = vector.load %arg22[%c0_66, %c0_67] : memref<16x32xf32, #tpu.memory_space<vmem>>, vector<16x32xf32>
    %107 = arith.truncf %103 : vector<16x32xf32> to vector<16x32xbf16>
    %108 = arith.truncf %106 : vector<16x32xf32> to vector<16x32xbf16>
    %cst_68 = arith.constant dense<0.000000e+00> : vector<16x16xf32>
    %109 = tpu.matmul %107, %108, %cst_68 {dimension_numbers = #tpu.dot_dimension_numbers<[1], [1], [0], [0], [0, 0, 1, 0], [], []>} : vector<16x32xbf16>, vector<16x32xbf16>, vector<16x16xf32> -> vector<16x16xf32>
    %c0_69 = arith.constant 0 : index
    %c0_70 = arith.constant 0 : index
    %110 = vector.load %arg23[%c0_69, %c0_70] : memref<16x32xf32, #tpu.memory_space<vmem>>, vector<16x32xf32>
    %111 = arith.truncf %101 : vector<16x32xf32> to vector<16x32xbf16>
    %112 = arith.truncf %110 : vector<16x32xf32> to vector<16x32xbf16>
    %cst_71 = arith.constant dense<0.000000e+00> : vector<16x16xf32>
    %113 = tpu.matmul %111, %112, %cst_71 {dimension_numbers = #tpu.dot_dimension_numbers<[1], [1], [0], [0], [0, 0, 1, 0], [], []>} : vector<16x32xbf16>, vector<16x32xbf16>, vector<16x16xf32> -> vector<16x16xf32>
    %114 = arith.addf %109, %113 : vector<16x16xf32>
    %cst_72 = arith.constant 0.000000e+00 : bf16
    %115 = vector.broadcast %cst_72 : bf16 to vector<16x16xbf16>
    %116 = arith.cmpf ogt, %105, %115 : vector<16x16xbf16>
    %cst_73 = arith.constant -9.000000e+15 : f32
    %117 = vector.broadcast %cst_73 : f32 to vector<16x16xf32>
    %118 = arith.select %116, %114, %117 : vector<16x16xi1>, vector<16x16xf32>
    %cst_74 = arith.constant dense<0xFF800000> : vector<16xf32>
    %119 = vector.multi_reduction <maximumf>, %118, %cst_74 [1] : vector<16x16xf32> to vector<16xf32>
    %120 = vector.shape_cast %119 : vector<16xf32> to vector<16x1xf32>
    %121 = vector.broadcast %120 : vector<16x1xf32> to vector<16x16xf32>
    %122 = arith.subf %118, %121 : vector<16x16xf32>
    %123 = math.exp %122 : vector<16x16xf32>
    %cst_75 = arith.constant dense<0.000000e+00> : vector<16xf32>
    %124 = vector.multi_reduction <add>, %123, %cst_75 [1] : vector<16x16xf32> to vector<16xf32>
    %125 = vector.shape_cast %124 : vector<16xf32> to vector<16x1xf32>
    %126 = vector.broadcast %125 : vector<16x1xf32> to vector<16x16xf32>
    %127 = arith.divf %123, %126 : vector<16x16xf32>
    %128 = arith.extf %105 : vector<16x16xbf16> to vector<16x16xf32>
    %129 = arith.mulf %127, %128 : vector<16x16xf32>
    %c0_76 = arith.constant 0 : index
    %c0_77 = arith.constant 0 : index
    %130 = vector.load %arg22[%c0_76, %c0_77] : memref<16x32xf32, #tpu.memory_space<vmem>>, vector<16x32xf32>
    %131 = arith.truncf %129 : vector<16x16xf32> to vector<16x16xbf16>
    %132 = arith.truncf %130 : vector<16x32xf32> to vector<16x32xbf16>
    %cst_78 = arith.constant dense<0.000000e+00> : vector<16x32xf32>
    %133 = tpu.matmul %131, %132, %cst_78 {dimension_numbers = #tpu.dot_dimension_numbers<[1], [0], [0], [1], [0, 0, 1, 1], [], []>} : vector<16x16xbf16>, vector<16x32xbf16>, vector<16x32xf32> -> vector<16x32xf32>
    %cst_79 = arith.constant 0.000000e+00 : f32
    %134 = vector.broadcast %cst_79 : f32 to vector<16x32xf32>
    %135 = arith.maximumf %133, %134 : vector<16x32xf32>
    %136 = arith.index_cast %99 : i32 to index
    %c0_80 = arith.constant 0 : index
    %137 = vector.load %arg24[%136, %c0_80] : memref<16x32xf32, #tpu.memory_space<vmem>>, vector<16x32xf32>
    tpu.vector_store %arg24[%136, %c0_80], %135 {strides = array<i32>} : memref<16x32xf32, #tpu.memory_space<vmem>>, vector<16x32xf32>,
    %c1_i32_81 = arith.constant 1 : i32
    %c0_82 = arith.constant 0 : index
    %c0_83 = arith.constant 0 : index
    %138 = vector.load %arg24[%c0_82, %c0_83] : memref<16x32xf32, #tpu.memory_space<vmem>>, vector<16x32xf32>
    %c0_84 = arith.constant 0 : index
    %c0_85 = arith.constant 0 : index
    %139 = vector.load %arg14[%c0_84, %c0_85] : memref<32x1xf32, #tpu.memory_space<vmem>>, vector<32x1xf32>
    %140 = arith.truncf %83 : vector<16x32xf32> to vector<16x32xbf16>
    %141 = arith.truncf %139 : vector<32x1xf32> to vector<32x1xbf16>
    %cst_86 = arith.constant dense<0.000000e+00> : vector<16x1xf32>
    %142 = tpu.matmul %140, %141, %cst_86 {dimension_numbers = #tpu.dot_dimension_numbers<[1], [0], [0], [1], [0, 0, 1, 1], [], []>} : vector<16x32xbf16>, vector<32x1xbf16>, vector<16x1xf32> -> vector<16x1xf32>
    %c0_87 = arith.constant 0 : index
    %c0_88 = arith.constant 0 : index
    %143 = vector.load %arg15[%c0_87, %c0_88] : memref<32x1xf32, #tpu.memory_space<vmem>>, vector<32x1xf32>
    %144 = arith.truncf %138 : vector<16x32xf32> to vector<16x32xbf16>
    %145 = arith.truncf %143 : vector<32x1xf32> to vector<32x1xbf16>
    %cst_89 = arith.constant dense<0.000000e+00> : vector<16x1xf32>
    %146 = tpu.matmul %144, %145, %cst_89 {dimension_numbers = #tpu.dot_dimension_numbers<[1], [0], [0], [1], [0, 0, 1, 1], [], []>} : vector<16x32xbf16>, vector<32x1xbf16>, vector<16x1xf32> -> vector<16x1xf32>
    %147 = arith.addf %142, %146 : vector<16x1xf32>
    %c0_90 = arith.constant 0 : index
    %c0_91 = arith.constant 0 : index
    %148 = vector.load %arg16[%c0_90, %c0_91] : memref<1x1xf32, #tpu.memory_space<vmem>>, vector<1x1xf32>
    %149 = vector.broadcast %148 : vector<1x1xf32> to vector<16x1xf32>
    %150 = arith.addf %147, %149 : vector<16x1xf32>
    %151 = arith.negf %150 : vector<16x1xf32>
    %152 = math.exp %151 : vector<16x1xf32>
    %cst_92 = arith.constant 1.000000e+00 : f32
    %153 = vector.broadcast %cst_92 : f32 to vector<16x1xf32>
    %154 = arith.addf %153, %152 : vector<16x1xf32>
    %155 = arith.divf %153, %154 : vector<16x1xf32>
    %156 = vector.broadcast %155 : vector<16x1xf32> to vector<16x32xf32>
    %157 = arith.mulf %156, %83 : vector<16x32xf32>
    %cst_93 = arith.constant 1.000000e+00 : f32
    %158 = vector.broadcast %cst_93 : f32 to vector<16x1xf32>
    %159 = arith.subf %158, %155 : vector<16x1xf32>
    %160 = vector.broadcast %159 : vector<16x1xf32> to vector<16x32xf32>
    %161 = arith.mulf %160, %138 : vector<16x32xf32>
    %162 = arith.addf %157, %161 : vector<16x32xf32>
    %c0_94 = arith.constant 0 : index
    %c0_95 = arith.constant 0 : index
    %163 = vector.load %arg17[%c0_94, %c0_95] : memref<32x32xf32, #tpu.memory_space<vmem>>, vector<32x32xf32>
    %164 = arith.truncf %162 : vector<16x32xf32> to vector<16x32xbf16>
    %165 = arith.truncf %163 : vector<32x32xf32> to vector<32x32xbf16>
    %cst_96 = arith.constant dense<0.000000e+00> : vector<16x32xf32>
    %166 = tpu.matmul %164, %165, %cst_96 {dimension_numbers = #tpu.dot_dimension_numbers<[1], [0], [0], [1], [0, 0, 1, 1], [], []>} : vector<16x32xbf16>, vector<32x32xbf16>, vector<16x32xf32> -> vector<16x32xf32>
    %c0_97 = arith.constant 0 : index
    %c0_98 = arith.constant 0 : index
    %167 = vector.load %arg18[%c0_97, %c0_98] : memref<1x32xf32, #tpu.memory_space<vmem>>, vector<1x32xf32>
    %168 = vector.broadcast %167 : vector<1x32xf32> to vector<16x32xf32>
    %169 = arith.addf %166, %168 : vector<16x32xf32>
    %c0_99 = arith.constant 0 : index
    %c0_100 = arith.constant 0 : index
    %170 = vector.load %arg3[%c0_99, %c0_100] : memref<16x16xbf16, #tpu.memory_space<vmem>>, vector<16x16xbf16>
    %171 = arith.truncf %169 : vector<16x32xf32> to vector<16x32xbf16>
    %cst_101 = arith.constant dense<0.000000e+00> : vector<16x32xf32>
    %172 = tpu.matmul %170, %171, %cst_101 {dimension_numbers = #tpu.dot_dimension_numbers<[1], [0], [0], [1], [0, 0, 1, 1], [], []>} : vector<16x16xbf16>, vector<16x32xbf16>, vector<16x32xf32> -> vector<16x32xf32>
    %cst_102 = arith.constant 0.000000e+00 : f32
    %173 = vector.broadcast %cst_102 : f32 to vector<16x32xf32>
    %174 = arith.maximumf %172, %173 : vector<16x32xf32>
    %175 = arith.addf %162, %174 : vector<16x32xf32>
    %c0_103 = arith.constant 0 : index
    %c0_104 = arith.constant 0 : index
    %176 = vector.load %arg19[%c0_103, %c0_104] : memref<32x32xf32, #tpu.memory_space<vmem>>, vector<32x32xf32>
    %177 = arith.truncf %175 : vector<16x32xf32> to vector<16x32xbf16>
    %178 = arith.truncf %176 : vector<32x32xf32> to vector<32x32xbf16>
    %cst_105 = arith.constant dense<0.000000e+00> : vector<16x32xf32>
    %179 = tpu.matmul %177, %178, %cst_105 {dimension_numbers = #tpu.dot_dimension_numbers<[1], [0], [0], [1], [0, 0, 1, 1], [], []>} : vector<16x32xbf16>, vector<32x32xbf16>, vector<16x32xf32> -> vector<16x32xf32>
    %c0_106 = arith.constant 0 : index
    %c0_107 = arith.constant 0 : index
    %180 = vector.load %arg20[%c0_106, %c0_107] : memref<1x32xf32, #tpu.memory_space<vmem>>, vector<1x32xf32>
    %181 = vector.broadcast %180 : vector<1x32xf32> to vector<16x32xf32>
    %182 = arith.addf %179, %181 : vector<16x32xf32>
    %c0_108 = arith.constant 0 : index
    %c0_109 = arith.constant 0 : index
    %183 = vector.load %arg3[%c0_108, %c0_109] : memref<16x16xbf16, #tpu.memory_space<vmem>>, vector<16x16xbf16>
    %184 = arith.truncf %182 : vector<16x32xf32> to vector<16x32xbf16>
    %cst_110 = arith.constant dense<0.000000e+00> : vector<16x32xf32>
    %185 = tpu.matmul %183, %184, %cst_110 {dimension_numbers = #tpu.dot_dimension_numbers<[1], [0], [0], [1], [0, 0, 1, 1], [], []>} : vector<16x16xbf16>, vector<16x32xbf16>, vector<16x32xf32> -> vector<16x32xf32>
    %cst_111 = arith.constant 0.000000e+00 : f32
    %186 = vector.broadcast %cst_111 : f32 to vector<16x32xf32>
    %187 = arith.maximumf %185, %186 : vector<16x32xf32>
    %188 = arith.addf %175, %187 : vector<16x32xf32>
    %c0_112 = arith.constant 0 : index
    %c0_113 = arith.constant 0 : index
    %189 = vector.load %arg21[%c0_112, %c0_113] : memref<16x32xf32, #tpu.memory_space<vmem>>, vector<16x32xf32>
    tpu.vector_store %arg21[%c0_112, %c0_113], %188 {strides = array<i32>} : memref<16x32xf32, #tpu.memory_space<vmem>>, vector<16x32xf32>,
    return
  }
  func.func @transform_0(%arg0: i32) -> (i32, i32) {
    %c0_i32 = arith.constant 0 : i32
    %c0_i32_0 = arith.constant 0 : i32
    %c0_i32_1 = arith.constant 0 : i32
    return %c0_i32, %c0_i32_0 : i32, i32
  }
  func.func @transform_1(%arg0: i32) -> (i32, i32) {
    %c0_i32 = arith.constant 0 : i32
    %c0_i32_0 = arith.constant 0 : i32
    %c0_i32_1 = arith.constant 0 : i32
    return %c0_i32, %c0_i32_0 : i32, i32
  }
  func.func @transform_2(%arg0: i32) -> (i32, i32) {
    %c0_i32 = arith.constant 0 : i32
    %c0_i32_0 = arith.constant 0 : i32
    %c0_i32_1 = arith.constant 0 : i32
    return %c0_i32, %c0_i32_0 : i32, i32
  }
  func.func @transform_3(%arg0: i32) -> (i32, i32) {
    %c0_i32 = arith.constant 0 : i32
    %c0_i32_0 = arith.constant 0 : i32
    %c0_i32_1 = arith.constant 0 : i32
    return %c0_i32, %c0_i32_0 : i32, i32
  }
  func.func @transform_4(%arg0: i32) -> (i32, i32) {
    %c0_i32 = arith.constant 0 : i32
    %c0_i32_0 = arith.constant 0 : i32
    %c0_i32_1 = arith.constant 0 : i32
    return %c0_i32, %c0_i32_0 : i32, i32
  }
  func.func @transform_5(%arg0: i32) -> (i32, i32) {
    %c0_i32 = arith.constant 0 : i32
    %c0_i32_0 = arith.constant 0 : i32
    %c0_i32_1 = arith.constant 0 : i32
    return %c0_i32, %c0_i32_0 : i32, i32
  }
  func.func @transform_6(%arg0: i32) -> (i32, i32) {
    %c0_i32 = arith.constant 0 : i32
    %c0_i32_0 = arith.constant 0 : i32
    %c0_i32_1 = arith.constant 0 : i32
    return %c0_i32, %c0_i32_0 : i32, i32
  }
  func.func @transform_7(%arg0: i32) -> (i32, i32) {
    %c0_i32 = arith.constant 0 : i32
    %c0_i32_0 = arith.constant 0 : i32
    %c0_i32_1 = arith.constant 0 : i32
    return %c0_i32, %c0_i32_0 : i32, i32
  }
  func.func @transform_8(%arg0: i32) -> (i32, i32) {
    %c0_i32 = arith.constant 0 : i32
    %c0_i32_0 = arith.constant 0 : i32
    %c0_i32_1 = arith.constant 0 : i32
    return %c0_i32, %c0_i32_0 : i32, i32
  }
  func.func @transform_9(%arg0: i32) -> (i32, i32) {
    %c0_i32 = arith.constant 0 : i32
    %c0_i32_0 = arith.constant 0 : i32
    %c0_i32_1 = arith.constant 0 : i32
    return %c0_i32, %c0_i32_0 : i32, i32
  }
  func.func @transform_10(%arg0: i32) -> (i32, i32) {
    %c0_i32 = arith.constant 0 : i32
    %c0_i32_0 = arith.constant 0 : i32
    %c0_i32_1 = arith.constant 0 : i32
    return %c0_i32, %c0_i32_0 : i32, i32
  }
  func.func @transform_11(%arg0: i32) -> (i32, i32) {
    %c0_i32 = arith.constant 0 : i32
    %c0_i32_0 = arith.constant 0 : i32
    %c0_i32_1 = arith.constant 0 : i32
    return %c0_i32, %c0_i32_0 : i32, i32
  }
  func.func @transform_12(%arg0: i32) -> (i32, i32) {
    %c0_i32 = arith.constant 0 : i32
    %c0_i32_0 = arith.constant 0 : i32
    %c0_i32_1 = arith.constant 0 : i32
    return %c0_i32, %c0_i32_0 : i32, i32
  }
  func.func @transform_13(%arg0: i32) -> (i32, i32) {
    %c0_i32 = arith.constant 0 : i32
    %c0_i32_0 = arith.constant 0 : i32
    %c0_i32_1 = arith.constant 0 : i32
    return %c0_i32, %c0_i32_0 : i32, i32
  }
  func.func @transform_14(%arg0: i32) -> (i32, i32) {
    %c0_i32 = arith.constant 0 : i32
    %c0_i32_0 = arith.constant 0 : i32
    %c0_i32_1 = arith.constant 0 : i32
    return %c0_i32, %c0_i32_0 : i32, i32
  }
  func.func @transform_15(%arg0: i32) -> (i32, i32) {
    %c0_i32 = arith.constant 0 : i32
    %c0_i32_0 = arith.constant 0 : i32
    %c0_i32_1 = arith.constant 0 : i32
    return %c0_i32, %c0_i32_0 : i32, i32
  }
  func.func @transform_16(%arg0: i32) -> (i32, i32) {
    %c0_i32 = arith.constant 0 : i32
    %c0_i32_0 = arith.constant 0 : i32
    %c0_i32_1 = arith.constant 0 : i32
    return %c0_i32, %c0_i32_0 : i32, i32
  }
  func.func @transform_17(%arg0: i32) -> (i32, i32) {
    %c0_i32 = arith.constant 0 : i32
    %c0_i32_0 = arith.constant 0 : i32
    %c0_i32_1 = arith.constant 0 : i32
    return %c0_i32, %c0_i32_0 : i32, i32
  }
  func.func @transform_18(%arg0: i32) -> (i32, i32) {
    %c0_i32 = arith.constant 0 : i32
    %c0_i32_0 = arith.constant 0 : i32
    %c0_i32_1 = arith.constant 0 : i32
    return %c0_i32, %c0_i32_0 : i32, i32
  }
  func.func @transform_19(%arg0: i32) -> (i32, i32) {
    %c0_i32 = arith.constant 0 : i32
    %c0_i32_0 = arith.constant 0 : i32
    %c0_i32_1 = arith.constant 0 : i32
    return %c0_i32, %c0_i32_0 : i32, i32
  }
  func.func @transform_20(%arg0: i32) -> (i32, i32) {
    %c0_i32 = arith.constant 0 : i32
    %c0_i32_0 = arith.constant 0 : i32
    %c0_i32_1 = arith.constant 0 : i32
    return %c0_i32, %c0_i32_0 : i32, i32
  }
}

</mosaic_0001>

<bundles_post_ra>
// kernel: tpu_custom_call.1
= control target key start
LH: loop header
LB: loop body
LE: loop exit
PB: predicated region body
PF: predicated region fallthrough
CT: control target
= control target key end

     0   :  { %s2193_s0 = inlined_call_operand.hbm [shape: f32[16,16], index: 0, kind: input, shape index: {}]   ;;  %s2194_s1 = inlined_call_operand.hbm [shape: bf16[16,16], index: 1, kind: input, shape index: {}]   ;;  %s2195_s2 = inlined_call_operand.hbm [shape: bf16[16,16], index: 2, kind: input, shape index: {}]   ;;  %s2196_s3 = inlined_call_operand.hbm [shape: f32[16,32], index: 3, kind: input, shape index: {}]   ;;  %s2197_s4 = inlined_call_operand.vmem [shape: f32[32,32], index: 4, kind: input, shape index: {}]   ;;  %s2198_s5 = inlined_call_operand.vmem [shape: f32[1,32], index: 5, kind: input, shape index: {}]   ;;  %s2199_s6 = inlined_call_operand.vmem [shape: f32[32,32], index: 6, kind: input, shape index: {}]   ;;  %s2200_s7 = inlined_call_operand.vmem [shape: f32[32,1], index: 7, kind: input, shape index: {}]   ;;  %s2201_s8 = inlined_call_operand.vmem [shape: f32[32,1], index: 8, kind: input, shape index: {}]   ;;  %s2202_s9 = inlined_call_operand.<no memory space> [shape: f32[1,1], index: 9, kind: input, shape index: {}]   ;;  %s2203_s10 = inlined_call_operand.vmem [shape: f32[32,32], index: 10, kind: input, shape index: {}]   ;;  %s2204_s11 = inlined_call_operand.hbm [shape: f32[1,32], index: 11, kind: input, shape index: {}]   ;;  %s2205_s12 = inlined_call_operand.vmem [shape: f32[32,32], index: 12, kind: input, shape index: {}]   ;;  %s2206_s13 = inlined_call_operand.vmem [shape: f32[32,1], index: 13, kind: input, shape index: {}]   ;;  %s2207_s14 = inlined_call_operand.vmem [shape: f32[32,1], index: 14, kind: input, shape index: {}]   ;;  %s2208_s16 = inlined_call_operand.vmem [shape: f32[32,32], index: 16, kind: input, shape index: {}]   ;;  %s2209_s17 = inlined_call_operand.vmem [shape: f32[1,32], index: 17, kind: input, shape index: {}]   ;;  %s2210_s18 = inlined_call_operand.hbm [shape: f32[32,32], index: 18, kind: input, shape index: {}]   ;;  %s2211_s19 = inlined_call_operand.vmem [shape: f32[1,32], index: 19, kind: input, shape index: {}]   ;;  %s2212_s20 = inlined_call_operand.hbm [shape: f32[16,32], index: 20, kind: output, shape index: {}]   ;;  %s2213_s15 = inlined_call_operand.<no memory space> [shape: f32[1,1], index: 15, kind: input, shape index: {}]  }
   0x1   :  { %2215 = sst [smem:[#allocation24_spill]] %s2193_s0  ;;  %v25_v0 = vstv %s2202_s9  ;;  %v27_v1 = vstv %s2213_s15 }
   0x2   :  { %2216 = sst [smem:[#allocation25_spill]] %s2194_s1  ;;  %26 = vst [vmem:[#allocation5] sm:$0x1] %v25_v0  ;;  %28 = vst [vmem:[#allocation6] sm:$0x1] %v27_v1 }
   0x3   :  { %2217 = sst [smem:[#allocation26_spill]] %s2195_s2 }
   0x4   :  { %2218 = sst [smem:[#allocation27_spill]] %s2196_s3 }
   0x5   :  { %2219 = sst [smem:[#allocation28_spill]] %s2197_s4 }
   0x6   :  { %29 = vsyncpa [#allocation8], 0 }
   0x7   :  { %30 = vsyncpa [#allocation11], 0 }
   0x8   :  { %31 = vsyncpa [#allocation14], 0 }
   0x9   :  { %32 = vsyncpa [#allocation17], 0 }
   0xa   :  { %33 = vsyncpa [#allocation9], 0  ;;  %s1770_s2 = smov [#allocation10]  }
   0xb   :  { %s51_s25 = sshll.u32 %s1770_s2, 4  ;;  %s52_s25 = int_to_ptr.vmem [resolvable:$true] %s51_s25 }
   0xc   :  { %s1628_s3 = scalar_lea.vmem %s52_s25, 128  ;;  %p1633_p1 = scmp.lt.s32.totalorder %s52_s25, %s52_s25 }
   0xd   :  { %p1629_p0 = scmp.ne.s32.totalorder %s52_s25, %s1628_s3  ;;  %p1634_p2 = scmp.lt.s32.totalorder %s1628_s3, %s1628_s3 }
   0xf   :  { %p1635_p3 = por %p1634_p2, %p1633_p1 }
  0x11   :  { %p1636_p4 = pnand %p1635_p3, %p1629_p0 }
  0x13   :  { %1639 = shalt.err (!%p1636_p4)
}
  0x14   :  { %s1771_s9 = smov 64   ;;  %s1772_s26 = smov 4  }
  0x15   :  { %s2220_s28 = sld [smem:[#allocation25_spill]]  ;;  %s1773_s4 = smov [#allocation13]  }
  0x16   :  { %s75_s29 = sshll.u32 %s1773_s4, 4  ;;  %s1774_s30 = smov [#allocation7]   ;;  %s76_s29 = int_to_ptr.vmem [resolvable:$true] %s75_s29 }
  0x17   :  { %s39_s0 = sshll.u32 %s1774_s30, 4  ;;  %s1648_s21 = scalar_lea.vmem %s76_s29, 256  ;;  %s40_s0 = int_to_ptr.vmem [resolvable:$true] %s39_s0 }
  0x18   :  { %p1649_p5 = scmp.ne.s32.totalorder %s76_s29, %s1648_s21  ;;  %p1653_p6 = scmp.lt.s32.totalorder %s76_s29, %s76_s29 }
  0x19   :  { %p1654_p7 = scmp.lt.s32.totalorder %s1648_s21, %s1648_s21 }
  0x1b   :  { %57 = dma.hbm_to_vmem [thread:$0]  %s2220_s28, 128, %s52_s25, [#allocation11], %s1771_s9, %s1771_s9, %s1772_s26  }
  0x1c   :  { %p1655_p8 = por %p1654_p7, %p1653_p6 }
  0x1e   :  { %p1656_p9 = pnand %p1655_p8, %p1649_p5 }
  0x20   :  { %1659 = shalt.err (!%p1656_p9)
}
  0x21   :  { %s1775_s1 = smov 128   ;;  %s1776_s22 = smov 8  }
  0x22   :  { %s2221_s2 = sld [smem:[#allocation27_spill]]  ;;  %s1668_s25 = scalar_lea.vmem %s40_s0, 256 }
  0x23   :  { %p1669_p10 = scmp.ne.s32.totalorder %s40_s0, %s1668_s25  ;;  %p1673_p11 = scmp.lt.s32.totalorder %s40_s0, %s40_s0 }
  0x24   :  { %p1674_p12 = scmp.lt.s32.totalorder %s1668_s25, %s1668_s25 }
  0x26   :  { %p1675_p13 = por %p1674_p12, %p1673_p11 }
  0x28   :  { %81 = dma.hbm_to_vmem [thread:$0]  %s2221_s2, 256, %s76_s29, [#allocation14], %s1775_s1, %s1775_s1, %s1776_s22  }
  0x29   :  { %p1676_p0 = pnand %p1675_p13, %p1669_p10 }
  0x2b   :  { %1679 = shalt.err (!%p1676_p0)
}
  0x2c   :  { %s2222_s27 = sld [smem:[#allocation24_spill]]  ;;  %s1777_s28 = smov [#allocation12]  }
  0x2d   :  { %s63_s4 = sshll.u32 %s1777_s28, 4  ;;  %s1778_s30 = smov [#allocation15]   ;;  %s64_s4 = int_to_ptr.vmem [resolvable:$true] %s63_s4 }
  0x2e   :  { %s102_s29 = sshll.u32 %s1778_s30, 4  ;;  %s1688_s21 = scalar_lea.vmem %s64_s4, 128  ;;  %s103_s29 = int_to_ptr.vmem [resolvable:$true] %s102_s29 }
  0x2f   :  { %p1689_p1 = scmp.ne.s32.totalorder %s64_s4, %s1688_s21  ;;  %p1693_p2 = scmp.lt.s32.totalorder %s64_s4, %s64_s4 }
  0x30   :  { %p1694_p3 = scmp.lt.s32.totalorder %s1688_s21, %s1688_s21 }
  0x32   :  { %45 = dma.hbm_to_vmem [thread:$0]  %s2222_s27, 256, %s40_s0, [#allocation8], %s1775_s1, %s1775_s1, %s1776_s22  }
  0x33   :  { %p1695_p4 = por %p1694_p3, %p1693_p2 }
  0x35   :  { %p1696_p5 = pnand %p1695_p4, %p1689_p1 }
  0x37   :  { %1699 = shalt.err (!%p1696_p5)
}
  0x38   :  { %s2223_s2 = sld [smem:[#allocation26_spill]]  ;;  %s1708_s0 = scalar_lea.vmem %s103_s29, 16 }
  0x39   :  { %p1709_p6 = scmp.ne.s32.totalorder %s103_s29, %s1708_s0  ;;  %s1712_s25 = scalar_lea.vmem %s103_s29, 32 }
  0x3a   :  { %p1713_p7 = scmp.lt.s32.totalorder %s103_s29, %s103_s29  ;;  %p1714_p8 = scmp.lt.s32.totalorder %s1712_s25, %s1708_s0 }
  0x3c   :  { %p1715_p9 = por %p1714_p8, %p1713_p7 }
  0x3e   :  { %69 = dma.hbm_to_vmem [thread:$0]  %s2223_s2, 128, %s64_s4, [#allocation11], %s1771_s9, %s1771_s9, %s1772_s26  }
  0x3f   :  { %p1716_p10 = pnand %p1715_p9, %p1709_p6 }
  0x41   :  { %1719 = shalt.err (!%p1716_p10)
}
  0x42   :  { %105 = dma.hbm_to_vmem [thread:$0]  %s2204_s11, 16, %s103_s29, [#allocation14]  }
  0x43   :  { %s1779_s27 = smov [#allocation16]  }
  0x44   :  { %s123_s28 = sshll.u32 %s1779_s27, 4  ;;  %s124_s28 = int_to_ptr.vmem [resolvable:$true] %s123_s28 }
  0x45   :  { %s1728_s30 = scalar_lea.vmem %s124_s28, 512  ;;  %p1733_p12 = scmp.lt.s32.totalorder %s124_s28, %s124_s28 }
  0x46   :  { %p1729_p11 = scmp.ne.s32.totalorder %s124_s28, %s1728_s30  ;;  %p1734_p13 = scmp.lt.s32.totalorder %s1728_s30, %s1728_s30 }
  0x48   :  { %p1735_p0 = por %p1734_p13, %p1733_p12 }
  0x4a   :  { %p1736_p1 = pnand %p1735_p0, %p1729_p11 }
  0x4c   :  { %1739 = shalt.err (!%p1736_p1)
}
  0x4d   :  { %129 = dma.hbm_to_vmem [thread:$0]  %s2210_s18, 512, %s124_s28, [#allocation17], %s1775_s1, %s1775_s1, %s1776_s22  }
  0x4e   :  { %1760 = dma.done.wait [#allocation8], 256  }
  0x4f   :  { %1761 = vsyncadd [#allocation8], 4294967040 }
  0x50   :  { %1762 = dma.done.wait [#allocation11], 256  }
  0x51   :  { %1763 = vsyncadd [#allocation11], 4294967040 }
  0x52   :  { %1764 = dma.done.wait [#allocation14], 272  }
  0x53   :  { %1765 = vsyncadd [#allocation14], 4294967024 }
  0x54   :  { %1766 = dma.done.wait [#allocation17], 512  }
  0x55   :  { %1767 = vsyncadd [#allocation17], 4294966784  ;;  %v1780_v2 = vmov 0.0   ;;  %vm1781_vm0 = vmmov 0   ;;  %v155_v3 = vld [vmem:[#allocation13] sm:$0xff]  ;;  %v156_v4 = vld [vmem:[#allocation13 + $0x8] sm:$0xff] }
  0x56   :  { %1437 = vmatprep.subr.bf16.mxu0 %v1780_v2  ;;  %1439 = vmatprep.mubr.msk.bf16.mxu0 %vm1781_vm0, %v1780_v2  ;;  %v153_v5 = vld [vmem:[#allocation7] sm:$0xff]  ;;  %v158_v6 = vpack.c.bf16 %v156_v4, %v155_v3  ;;  %v154_v7 = vld [vmem:[#allocation7 + $0x8] sm:$0xff]  ;;  %vm159_vm1 = vcmask 130048   ;;  %s2224_s4 = sld [smem:[#allocation28_spill]]  ;;  %vm218_vm2 = vcmask 261120   ;;  %v268_v24 = vld [vmem:[%s2199_s6 + $0x8] sm:$0xff] }
  0x57   :  { %1443 = vmatprep.subr.bf16.mxu1 %v1780_v2  ;;  %1447 = vmatprep.mubr.msk.bf16.mxu1 %vm1781_vm0, %v1780_v2  ;;  %v157_v8 = vpack.c.bf16 %v154_v7, %v153_v5  ;;  %v269_v20 = vld [vmem:[%s2199_s6 + $0x10] sm:$0xff]  ;;  %v270_v21 = vld [vmem:[%s2199_s6 + $0x18] sm:$0xff]  ;;  %v267_v22 = vld [vmem:[%s2199_s6] sm:$0xff]  ;;  %v1782_v45 = vmov 0   ;;  %s1783_s25 = smov [#allocation18]  }
  0x58   :  { %1438 = vmatpush3.bf16.msra.mxu0 %v158_v6  ;;  %v273_v23 = vpack.c.bf16 %v270_v21, %v269_v20  ;;  %v272_v25 = vpack.c.bf16 %v268_v24, %v267_v22  ;;  %v1360_v26 = vld [vmem:[%s2198_s5] ss:$0 sm:$0xff]  ;;  %1585 = vset.pattern.permute.xlu0 %v1782_v45  ;;  %v324_v46 = vld [vmem:[#allocation10] sm:$0xf]  ;;  %v325_v47 = vld [vmem:[#allocation10 + $0x4] sm:$0xf] }
  0x59   :  { %1451 = vmatprep.subr.bf16.mxu0 %v1780_v2  ;;  %1586 = vset.pattern.permute.xlu1 %v1782_v45  ;;  %vm428_vm3 = vcmp.gt.bf16.partialorder %v324_v46, 0  ;;  %vm429_vm4 = vcmp.gt.bf16.partialorder %v325_v47, 0  ;;  %v461_v20 = vunpack.c.l.bf16 %v325_v47  ;;  %v517_v24 = vld [vmem:[%s2200_s7 + $0x10] sm:$0xff]  ;;  %s1344_s3 = sshll.u32 %s1783_s25, 4  ;;  %s1345_s3 = int_to_ptr.vmem [resolvable:$true] %s1344_s3 }
  0x5a   :  { %v430_v49 = vsel %vm428_vm3, 65537, %v1782_v45  ;;  %v431_v53 = vsel %vm429_vm4, 65537, %v1782_v45  ;;  %p1745_p3 = scmp.lt.s32.totalorder %s1345_s3, %s1345_s3 }
  0x5b   :  { %1440 = vmatmul.mubr.msk.bf16.vlgmr.msra.gmra.mxu0 %vm159_vm1, %v157_v8  ;;  %v432_v52 = vunpack.c.l.b16 %v430_v49  ;;  %v433_v56 = vunpack.c.l.b16 %v431_v53  ;;  %v1368_v53 = vld [vmem:[#allocation5] ss:$0 sm:$0xff] }
  0x5c   :  { %1455 = vmatprep.mubr.msk.bf16.mxu0 %vm1781_vm0, %v1780_v2  ;;  %v206_v9 = vld [vmem:[%s2224_s4 + $0x10] sm:$0xff]  ;;  %v207_v10 = vld [vmem:[%s2224_s4 + $0x18] sm:$0xff]  ;;  %v204_v12 = vld [vmem:[%s2224_s4] sm:$0xff]  ;;  %1452 = vmatpush3.bf16.msra.mxu0 %v273_v23 }
  0x5d   :  { %v210_v11 = vpack.c.bf16 %v207_v10, %v206_v9  ;;  %v205_v13 = vld [vmem:[%s2224_s4 + $0x8] sm:$0xff]  ;;  %1453 = vmatprep.subr.bf16.mxu0 %v1780_v2  ;;  %vm434_vm5 = vcmp.ne.s32.totalorder %v432_v52, 0  ;;  %vm435_vm6 = vcmp.ne.s32.totalorder %v433_v56, 0 }
  0x5e   :  { %v209_v14 = vpack.c.bf16 %v205_v13, %v204_v12 }
  0x5f   :  { %1444 = vmatpush3.bf16.msra.mxu1 %v210_v11 }
  0x60   :  { %1445 = vmatprep.subr.bf16.mxu1 %v1780_v2  ;;  %1454 = vmatpush3.bf16.msra.mxu0 %v272_v25  ;;  %v518_v25 = vld [vmem:[%s2200_s7 + $0x18] sm:$0xff] }
  0x61   :  { %1465 = vmatprep.subr.bf16.mxu0 %v1780_v2 }
  0x63   :  { %1446 = vmatpush3.bf16.msra.mxu1 %v209_v14 }
  0x64   :  { %1459 = vmatprep.subr.bf16.mxu1 %v1780_v2 }
 0x11b   :  { %v1952_v15 = vpop.f32.mrf.mxu0 }
 0x11d   :  { %v1441_v16 = vpop.f32.mrf.mxu0 }
 0x11f   :  { %v1954_v17 = vpop.f32.mrf.mxu0 }
 0x120   :  { %v1958_v18 = vpack.c.bf16 %v1954_v17, %v1952_v15 }
 0x121   :  { %v1442_v19 = vpop.f32.mrf.mxu0 }
 0x122   :  { %1448 = vmatmul.mubr.msk.bf16.vlgmr.msra.gmra.mxu1 %vm218_vm2, %v1958_v18  ;;  %v460_v19 = vunpack.c.l.bf16 %v324_v46 }
 0x123   :  { %1461 = vmatprep.mubr.msk.bf16.mxu1 %vm1781_vm0, %v1780_v2 }
 0x1e2   :  { %v256_v27 = vpop.f32.mrf.mxu1 }
 0x1e3   :  { %v257_v28 = vadd.f32 %v1360_v26, %v256_v27 }
 0x1e4   :  { %v1449_v29 = vpop.f32.mrf.mxu1 }
 0x1e5   :  { %263 = vst.msk [vmem:[#allocation2] sm:$0xff] %vm218_vm2, %v257_v28  ;;  %v520_v28 = vpack.c.bf16 %v518_v25, %v517_v24 }
 0x1e6   :  { %v259_v30 = vpop.f32.mrf.mxu1 }
 0x1e7   :  { %v260_v31 = vadd.f32 %v1360_v26, %v259_v30  ;;  %v515_v30 = vld [vmem:[%s2200_s7] sm:$0xff] }
 0x1e8   :  { %v1450_v32 = vpop.f32.mrf.mxu1 }
 0x1e9   :  { %264 = vst.msk [vmem:[#allocation2 + $0x8] sm:$0xff] %vm218_vm2, %v260_v31  ;;  %v516_v31 = vld [vmem:[%s2200_s7 + $0x8] sm:$0xff] }
 0x1ea   :  { %v519_v32 = vpack.c.bf16 %v516_v31, %v515_v30  ;;  %v725_v30 = vld [vmem:[%s2205_s12 + $0x8] sm:$0xff] }
 0x1ec   :  { %v265_v33 = vld [vmem:[#allocation2] sm:$0xff] }
 0x1f0   :  { %v266_v34 = vld [vmem:[#allocation2 + $0x8] sm:$0xff] }
 0x1f1   :  { %v271_v35 = vpack.c.bf16 %v266_v34, %v265_v33  ;;  %v523_v33 = vld [vmem:[%s2201_s8 + $0x10] sm:$0xff]  ;;  %v524_v34 = vld [vmem:[%s2201_s8 + $0x18] sm:$0xff] }
 0x1f3   :  { %1456 = vmatmul.mubr.msk.bf16.vlgmr.msra.gmra.mxu0 %vm218_vm2, %v271_v35  ;;  %v385_v36 = vsel %vm218_vm2, %v271_v35, 0 }
 0x1f4   :  { %1466 = vmatpush3.bf16.xpose.msra.mxu0 %v385_v36  ;;  %1467 = vmatprep.mubr.msk.bf16.mxu0 %vm1781_vm0, %v1780_v2  ;;  %v521_v36 = vld [vmem:[%s2201_s8] sm:$0xff] }
 0x1f5   :  { %1477 = vmatprep.subr.bf16.mxu0 %v1780_v2 }
 0x2b3   :  { %v311_v37 = vpop.f32.mrf.mxu0 }
 0x2b4   :  { %318 = vst.msk [vmem:[#allocation3] sm:$0xff] %vm218_vm2, %v311_v37 }
 0x2b5   :  { %v1457_v38 = vpop.f32.mrf.mxu0 }
 0x2b7   :  { %v314_v39 = vpop.f32.mrf.mxu0 }
 0x2b8   :  { %319 = vst.msk [vmem:[#allocation3 + $0x8] sm:$0xff] %vm218_vm2, %v314_v39 }
 0x2b9   :  { %v1458_v40 = vpop.f32.mrf.mxu0 }
 0x2bb   :  { %v322_v41 = vld [vmem:[#allocation3] sm:$0xff] }
 0x2bf   :  { %v323_v42 = vld [vmem:[#allocation3 + $0x8] sm:$0xff] }
 0x2c0   :  { %v328_v43 = vpack.c.bf16 %v323_v42, %v322_v41 }
 0x2c2   :  { %1468 = vmatmul.mubr.msk.bf16.vlgmr.msra.gmra.mxu0 %vm218_vm2, %v328_v43  ;;  %v338_v44 = vsel %vm218_vm2, %v328_v43, 0 }
 0x2c3   :  { %1460 = vmatpush3.bf16.xpose.msra.mxu1 %v338_v44  ;;  %1481 = vmatprep.mubr.msk.bf16.mxu0 %vm1781_vm0, %v1780_v2 }
 0x2c4   :  { %1471 = vmatprep.subr.bf16.mxu1 %v1780_v2 }
 0x2ca   :  { %1462 = vmatmul.mubr.msk.bf16.vlgmr.msra.gmra.mxu1 %vm218_vm2, %v271_v35 }
 0x2cb   :  { %1472 = vmatpush3.bf16.msra.mxu1 %v271_v35  ;;  %1473 = vmatprep.mubr.msk.bf16.mxu1 %vm1781_vm0, %v1780_v2  ;;  %v527_v35 = vpack.c.bf16 %v524_v34, %v523_v33 }
 0x2cc   :  { %1485 = vmatprep.subr.bf16.mxu1 %v1780_v2 }
 0x2cd   :  { %1478 = vmatpush3.bf16.msra.mxu0 %v527_v35 }
 0x2ce   :  { %1479 = vmatprep.subr.bf16.mxu0 %v1780_v2 }
 0x382   :  { %v421_v48 = vpop.f32.mrf.mxu0 }
 0x384   :  { %v1469_v50 = vpop.f32.mrf.mxu0 }
 0x386   :  { %v424_v51 = vpop.f32.mrf.mxu0 }
 0x388   :  { %v1470_v54 = vpop.f32.mrf.mxu0 }
 0x38a   :  { %v374_v55 = vpop.f32.mrf.mxu1 }
 0x38b   :  { %v422_v57 = vadd.f32 %v421_v48, %v374_v55 }
 0x38c   :  { %v1463_v58 = vpop.f32.mrf.mxu1 }
 0x38d   :  { %v436_v59 = vsel %vm434_vm5, %v422_v57, -9e+15 }
 0x38e   :  { %v377_v60 = vpop.f32.mrf.mxu1  ;;  %v438_v61 = vsel %vm159_vm1, %v436_v59, -inf }
 0x38f   :  { %v425_v62 = vadd.f32 %v424_v51, %v377_v60  ;;  %439 = vmax.xlane.f32.xlu0 %v438_v61 }
 0x390   :  { %v1464_v63 = vpop.f32.mrf.mxu1 }
 0x391   :  { %v437_v0 = vsel %vm435_vm6, %v425_v62, -9e+15 }
 0x392   :  { %v441_v1 = vsel %vm159_vm1, %v437_v0, -inf }
 0x393   :  { %442 = vmax.xlane.f32.xlu0 %v441_v1 }
 0x418   :  { %v440_v3 = vpop.xlane.xlu0 %439 }
 0x419   :  { %v444_v4 = vsub.f32 %v436_v59, %v440_v3 }
 0x41b   :  { %v446_v5 = vmul.f32 1.442695, %v444_v4 }
 0x41c   :  { %v443_v6 = vpop.xlane.xlu0 %442 }
 0x41d   :  { %1588 = vpow2.f32 %v446_v5  ;;  %v445_v7 = vsub.f32 %v437_v0, %v443_v6  ;;  %v664_v6 = vld [vmem:[%s2203_s10 + $0x10] sm:$0xff] }
 0x41f   :  { %v448_v8 = vmul.f32 1.442695, %v445_v7  ;;  %v665_v7 = vld [vmem:[%s2203_s10 + $0x18] sm:$0xff] }
 0x421   :  { %1590 = vpow2.f32 %v448_v8  ;;  %v668_v8 = vpack.c.bf16 %v665_v7, %v664_v6 }
 0x42a   :  { %v1589_v9 = vpop.eup %1588 }
 0x42b   :  { %v450_v10 = vsel %vm159_vm1, %v1589_v9, 0.0 }
 0x42c   :  { %451 = vadd.xlane.f32.xlu1 %v450_v10  ;;  %v662_v10 = vld [vmem:[%s2203_s10] sm:$0xff] }
 0x42e   :  { %v1591_v11 = vpop.eup %1590 }
 0x42f   :  { %v453_v12 = vsel %vm159_vm1, %v1591_v11, 0.0 }
 0x430   :  { %454 = vadd.xlane.f32.xlu1 %v453_v12 }
 0x4b5   :  { %v452_v13 = vpop.xlane.xlu1 %451 }
 0x4b6   :  { %1592 = vrcp.f32 %v452_v13 }
 0x4b9   :  { %v455_v14 = vpop.xlane.xlu1 %454 }
 0x4ba   :  { %1594 = vrcp.f32 %v455_v14 }
 0x4c3   :  { %v1593_v16 = vpop.eup %1592 }
 0x4c4   :  { %v457_v21 = vmul.f32 %v1593_v16, %v1589_v9 }
 0x4c6   :  { %v462_v26 = vmul.f32 %v460_v19, %v457_v21 }
 0x4c7   :  { %v1595_v22 = vpop.eup %1594 }
 0x4c8   :  { %v459_v23 = vmul.f32 %v1595_v22, %v1591_v11  ;;  %v663_v11 = vld [vmem:[%s2203_s10 + $0x8] sm:$0xff] }
 0x4c9   :  { %v667_v12 = vpack.c.bf16 %v663_v11, %v662_v10 }
 0x4ca   :  { %v463_v27 = vmul.f32 %v461_v20, %v459_v23 }
 0x4cc   :  { %v464_v29 = vpack.c.bf16 %v463_v27, %v462_v26 }
 0x4ce   :  { %1474 = vmatmul.mubr.msk.bf16.vlgmr.msra.gmra.mxu1 %vm159_vm1, %v464_v29 }
 0x4cf   :  { %1486 = vmatpush3.bf16.msra.mxu1 %v520_v28  ;;  %1489 = vmatprep.mubr.msk.bf16.mxu1 %vm1781_vm0, %v1780_v2  ;;  %v724_v28 = vld [vmem:[%s2205_s12] sm:$0xff] }
 0x4d0   :  { %1487 = vmatprep.subr.bf16.mxu1 %v1780_v2  ;;  %v729_v31 = vpack.c.bf16 %v725_v30, %v724_v28  ;;  %v975_v30 = vld [vmem:[%s2206_s13 + $0x18] sm:$0xff] }
 0x4d3   :  { %1488 = vmatpush3.bf16.msra.mxu1 %v519_v32  ;;  %v1371_v32 = vld [vmem:[#allocation15] ss:$0 sm:$0xff] }
 0x4d4   :  { %1501 = vmatprep.subr.bf16.mxu1 %v1780_v2 }
 0x4d6   :  { %1490 = vmatmul.mubr.msk.bf16.vlgmr.msra.gmra.mxu1 %vm218_vm2, %v1958_v18  ;;  %v522_v18 = vld [vmem:[%s2201_s8 + $0x8] sm:$0xff] }
 0x4d7   :  { %1505 = vmatprep.mubr.msk.bf16.mxu1 %vm1781_vm0, %v1780_v2  ;;  %v526_v37 = vpack.c.bf16 %v522_v18, %v521_v36 }
 0x4d9   :  { %1480 = vmatpush3.bf16.msra.mxu0 %v526_v37 }
 0x4da   :  { %1493 = vmatprep.subr.bf16.mxu0 %v1780_v2 }
 0x58e   :  { %v502_v38 = vpop.f32.mrf.mxu1 }
 0x58f   :  { %v509_v39 = vmax.f32 %v502_v38, 0.0 }
 0x590   :  { %v1475_v40 = vpop.f32.mrf.mxu1 }
 0x591   :  { %511 = vst.msk [vmem:[#allocation4] sm:$0xff] %vm218_vm2, %v509_v39 }
 0x592   :  { %v505_v41 = vpop.f32.mrf.mxu1 }
 0x593   :  { %v510_v42 = vmax.f32 %v505_v41, 0.0 }
 0x594   :  { %v1476_v43 = vpop.f32.mrf.mxu1 }
 0x595   :  { %512 = vst.msk [vmem:[#allocation4 + $0x8] sm:$0xff] %vm218_vm2, %v510_v42 }
 0x596   :  { %v606_v44 = vpop.f32.mrf.mxu1 }
 0x598   :  { %v1491_v46 = vpop.f32.mrf.mxu1  ;;  %v513_v49 = vld [vmem:[#allocation4] sm:$0xff] }
 0x59a   :  { %v609_v47 = vpop.f32.mrf.mxu1 }
 0x59c   :  { %v1492_v48 = vpop.f32.mrf.mxu1  ;;  %v514_v50 = vld [vmem:[#allocation4 + $0x8] sm:$0xff] }
 0x59d   :  { %v525_v51 = vpack.c.bf16 %v514_v50, %v513_v49 }
 0x59f   :  { %1482 = vmatmul.mubr.msk.bf16.vlgmr.msra.gmra.mxu0 %vm218_vm2, %v525_v51  ;;  %v781_v51 = vld [vmem:[#allocation10] sm:$0xf] }
 0x5a0   :  { %1497 = vmatprep.mubr.msk.bf16.mxu0 %vm1781_vm0, %v1780_v2  ;;  %1494 = vmatpush3.bf16.msra.mxu0 %v668_v8  ;;  %vm885_vm7 = vcmp.gt.bf16.partialorder %v781_v51, 0 }
 0x5a1   :  { %1495 = vmatprep.subr.bf16.mxu0 %v1780_v2 }
 0x5a4   :  { %1496 = vmatpush3.bf16.msra.mxu0 %v667_v12 }
 0x5a5   :  { %1509 = vmatprep.subr.bf16.mxu0 %v1780_v2 }
 0x65f   :  { %v565_v52 = vpop.f32.mrf.mxu0 }
 0x660   :  { %v607_v54 = vadd.f32 %v606_v44, %v565_v52  ;;  %v782_v52 = vld [vmem:[#allocation10 + $0x4] sm:$0xf] }
 0x661   :  { %v1483_v55 = vpop.f32.mrf.mxu0  ;;  %vm886_vm8 = vcmp.gt.bf16.partialorder %v782_v52, 0 }
 0x662   :  { %v620_v56 = vadd.f32 %v1368_v53, %v607_v54  ;;  %v887_v54 = vsel %vm885_vm7, 65537, %v1782_v45 }
 0x663   :  { %v568_v57 = vpop.f32.mrf.mxu0 }
 0x664   :  { %v1369_v58 = vmul.f32 -1.442695, %v620_v56  ;;  %v610_v59 = vadd.f32 %v609_v47, %v568_v57  ;;  %v889_v57 = vunpack.c.l.b16 %v887_v54 }
 0x665   :  { %v1484_v60 = vpop.f32.mrf.mxu0 }
 0x666   :  { %1596 = vpow2.f32 %v1369_v58  ;;  %v621_v61 = vadd.f32 %v1368_v53, %v610_v59  ;;  %v888_v58 = vsel %vm886_vm8, 65537, %v1782_v45  ;;  %vm891_vm9 = vcmp.ne.s32.totalorder %v889_v57, 0  ;;  %v1379_v57 = vld [vmem:[#allocation6] ss:$0 sm:$0xff] }
 0x668   :  { %v1370_v62 = vmul.f32 -1.442695, %v621_v61  ;;  %v890_v61 = vunpack.c.l.b16 %v888_v58 }
 0x66a   :  { %1598 = vpow2.f32 %v1370_v62  ;;  %vm892_vm10 = vcmp.ne.s32.totalorder %v890_v61, 0 }
 0x673   :  { %v1597_v63 = vpop.eup %1596 }
 0x674   :  { %v628_v0 = vadd.f32 1.0, %v1597_v63 }
 0x676   :  { %1600 = vrcp.f32 %v628_v0 }
 0x677   :  { %v1599_v1 = vpop.eup %1598 }
 0x678   :  { %v629_v3 = vadd.f32 1.0, %v1599_v1 }
 0x67a   :  { %1602 = vrcp.f32 %v629_v3 }
 0x683   :  { %v1601_v4 = vpop.eup %1600 }
 0x684   :  { %636 = vperm.xlu0 %1585, %v1601_v4   ;;  %v646_v5 = vsub.f32 1.0, %v1601_v4 }
 0x686   :  { %650 = vperm.xlu1 %1586, %v646_v5  }
 0x687   :  { %v1603_v9 = vpop.eup %1602 }
 0x688   :  { %v647_v13 = vsub.f32 1.0, %v1603_v9 }
 0x68a   :  { %641 = vperm.xlu1 %1586, %v1603_v9  }
 0x68e   :  { %655 = vperm.xlu1 %1586, %v647_v13  }
 0x6ff   :  { %v637_v19 = vpop.permute.xlu0 %636 }
 0x700   :  { %v644_v22 = vmul.f32 %v637_v19, %v1952_v15  ;;  %v726_v15 = vld [vmem:[%s2205_s12 + $0x10] sm:$0xff] }
 0x701   :  { %v651_v14 = vpop.permute.xlu1 %650 }
 0x702   :  { %v658_v20 = vmul.f32 %v651_v14, %v513_v49 }
 0x704   :  { %v2063_v25 = vadd.f32 %v658_v20, %v644_v22 }
 0x705   :  { %v642_v16 = vpop.permute.xlu1 %641 }
 0x706   :  { %v645_v23 = vmul.f32 %v642_v16, %v1954_v17  ;;  %v727_v17 = vld [vmem:[%s2205_s12 + $0x18] sm:$0xff] }
 0x707   :  { %v730_v29 = vpack.c.bf16 %v727_v17, %v726_v15 }
 0x709   :  { %v656_v21 = vpop.permute.xlu1 %655  ;;  %1502 = vmatpush3.bf16.msra.mxu1 %v730_v29  ;;  %v974_v29 = vld [vmem:[%s2206_s13 + $0x10] sm:$0xff] }
 0x70a   :  { %v659_v24 = vmul.f32 %v656_v21, %v514_v50  ;;  %1503 = vmatprep.subr.bf16.mxu1 %v1780_v2 }
 0x70c   :  { %v2065_v26 = vadd.f32 %v659_v24, %v645_v23  ;;  %v917_v23 = vunpack.c.l.bf16 %v781_v51  ;;  %v918_v24 = vunpack.c.l.bf16 %v782_v52 }
 0x70d   :  { %1504 = vmatpush3.bf16.msra.mxu1 %v729_v31 }
 0x70e   :  { %v2069_v27 = vpack.c.bf16 %v2065_v26, %v2063_v25  ;;  %1515 = vmatprep.subr.bf16.mxu1 %v1780_v2 }
 0x710   :  { %1498 = vmatmul.mubr.msk.bf16.vlgmr.msra.gmra.mxu0 %vm218_vm2, %v2069_v27 }
 0x711   :  { %1511 = vmatprep.mubr.msk.bf16.mxu0 %vm1781_vm0, %v1780_v2 }
 0x7d0   :  { %v713_v33 = vpop.f32.mrf.mxu0 }
 0x7d1   :  { %v714_v34 = vadd.f32 %v1371_v32, %v713_v33  ;;  %v977_v33 = vpack.c.bf16 %v975_v30, %v974_v29 }
 0x7d2   :  { %v1499_v35 = vpop.f32.mrf.mxu0 }
 0x7d3   :  { %720 = vst.msk [vmem:[#allocation2] sm:$0xff] %vm218_vm2, %v714_v34  ;;  %v972_v35 = vld [vmem:[%s2206_s13] sm:$0xff] }
 0x7d4   :  { %v716_v36 = vpop.f32.mrf.mxu0 }
 0x7d5   :  { %v717_v18 = vadd.f32 %v1371_v32, %v716_v36  ;;  %v973_v36 = vld [vmem:[%s2206_s13 + $0x8] sm:$0xff] }
 0x7d6   :  { %v1500_v37 = vpop.f32.mrf.mxu0 }
 0x7d7   :  { %721 = vst.msk [vmem:[#allocation2 + $0x8] sm:$0xff] %vm218_vm2, %v717_v18  ;;  %v976_v18 = vpack.c.bf16 %v973_v36, %v972_v35  ;;  %v980_v37 = vld [vmem:[%s2207_s14 + $0x10] sm:$0xff] }
 0x7da   :  { %v722_v38 = vld [vmem:[#allocation2] sm:$0xff] }
 0x7de   :  { %v723_v39 = vld [vmem:[#allocation2 + $0x8] sm:$0xff] }
 0x7df   :  { %v728_v40 = vpack.c.bf16 %v723_v39, %v722_v38  ;;  %v981_v38 = vld [vmem:[%s2207_s14 + $0x18] sm:$0xff] }
 0x7e0   :  { %v984_v39 = vpack.c.bf16 %v981_v38, %v980_v37  ;;  %v1587_v37 = vld [vmem:[#allocation12] sm:$0xff]   ;;  %v1235_v38 = vld [vmem:[#allocation16 + $0x10] sm:$0xff] }
 0x7e1   :  { %1506 = vmatmul.mubr.msk.bf16.vlgmr.msra.gmra.mxu1 %vm218_vm2, %v728_v40  ;;  %v842_v41 = vsel %vm218_vm2, %v728_v40, 0 }
 0x7e2   :  { %1516 = vmatpush3.bf16.xpose.msra.mxu1 %v842_v41  ;;  %1517 = vmatprep.mubr.msk.bf16.mxu1 %vm1781_vm0, %v1780_v2 }
 0x7e3   :  { %1527 = vmatprep.subr.bf16.mxu1 %v1780_v2 }
 0x8a1   :  { %v768_v42 = vpop.f32.mrf.mxu1 }
 0x8a2   :  { %775 = vst.msk [vmem:[#allocation3] sm:$0xff] %vm218_vm2, %v768_v42 }
 0x8a3   :  { %v1507_v43 = vpop.f32.mrf.mxu1 }
 0x8a5   :  { %v771_v44 = vpop.f32.mrf.mxu1 }
 0x8a6   :  { %776 = vst.msk [vmem:[#allocation3 + $0x8] sm:$0xff] %vm218_vm2, %v771_v44 }
 0x8a7   :  { %v1508_v46 = vpop.f32.mrf.mxu1 }
 0x8a9   :  { %v779_v47 = vld [vmem:[#allocation3] sm:$0xff] }
 0x8ad   :  { %v780_v48 = vld [vmem:[#allocation3 + $0x8] sm:$0xff] }
 0x8ae   :  { %v785_v49 = vpack.c.bf16 %v780_v48, %v779_v47 }
 0x8b0   :  { %1518 = vmatmul.mubr.msk.bf16.vlgmr.msra.gmra.mxu1 %vm218_vm2, %v785_v49  ;;  %v795_v50 = vsel %vm218_vm2, %v785_v49, 0 }
 0x8b1   :  { %1510 = vmatpush3.bf16.xpose.msra.mxu0 %v795_v50  ;;  %1531 = vmatprep.mubr.msk.bf16.mxu1 %vm1781_vm0, %v1780_v2 }
 0x8b2   :  { %1521 = vmatprep.subr.bf16.mxu0 %v1780_v2  ;;  %1528 = vmatpush3.bf16.msra.mxu1 %v984_v39  ;;  %v1236_v39 = vld [vmem:[#allocation16 + $0x18] sm:$0xff] }
 0x8b3   :  { %1529 = vmatprep.subr.bf16.mxu1 %v1780_v2 }
 0x8b8   :  { %1512 = vmatmul.mubr.msk.bf16.vlgmr.msra.gmra.mxu0 %vm218_vm2, %v728_v40 }
 0x8b9   :  { %1522 = vmatpush3.bf16.msra.mxu0 %v728_v40  ;;  %1523 = vmatprep.mubr.msk.bf16.mxu0 %vm1781_vm0, %v1780_v2  ;;  %v978_v40 = vld [vmem:[%s2207_s14] sm:$0xff] }
 0x8ba   :  { %1535 = vmatprep.subr.bf16.mxu0 %v1780_v2 }
 0x970   :  { %v878_v53 = vpop.f32.mrf.mxu1 }
 0x972   :  { %v1519_v55 = vpop.f32.mrf.mxu1 }
 0x974   :  { %v881_v56 = vpop.f32.mrf.mxu1 }
 0x976   :  { %v1520_v59 = vpop.f32.mrf.mxu1 }
 0x978   :  { %v831_v60 = vpop.f32.mrf.mxu0 }
 0x979   :  { %v879_v62 = vadd.f32 %v878_v53, %v831_v60 }
 0x97a   :  { %v1513_v63 = vpop.f32.mrf.mxu0 }
 0x97b   :  { %v893_v0 = vsel %vm891_vm9, %v879_v62, -9e+15 }
 0x97c   :  { %v834_v1 = vpop.f32.mrf.mxu0  ;;  %v895_v3 = vsel %vm159_vm1, %v893_v0, -inf }
 0x97d   :  { %v882_v4 = vadd.f32 %v881_v56, %v834_v1  ;;  %896 = vmax.xlane.f32.xlu1 %v895_v3 }
 0x97e   :  { %v1514_v5 = vpop.f32.mrf.mxu0 }
 0x97f   :  { %v894_v6 = vsel %vm892_vm10, %v882_v4, -9e+15 }
 0x980   :  { %v898_v7 = vsel %vm159_vm1, %v894_v6, -inf }
 0x981   :  { %899 = vmax.xlane.f32.xlu0 %v898_v7 }
 0xa06   :  { %v897_v8 = vpop.xlane.xlu1 %896 }
 0xa07   :  { %v901_v45 = vsub.f32 %v893_v0, %v897_v8 }
 0xa09   :  { %v903_v9 = vmul.f32 1.442695, %v901_v45  ;;  %v1121_v45 = vld [vmem:[%s2208_s16 + $0x10] sm:$0xff] }
 0xa0a   :  { %v900_v10 = vpop.xlane.xlu0 %899 }
 0xa0b   :  { %1604 = vpow2.f32 %v903_v9  ;;  %v902_v11 = vsub.f32 %v894_v6, %v900_v10  ;;  %v1122_v9 = vld [vmem:[%s2208_s16 + $0x18] sm:$0xff] }
 0xa0c   :  { %v1125_v10 = vpack.c.bf16 %v1122_v9, %v1121_v45 }
 0xa0d   :  { %v905_v12 = vmul.f32 1.442695, %v902_v11 }
 0xa0f   :  { %1606 = vpow2.f32 %v905_v12 }
 0xa18   :  { %v1605_v13 = vpop.eup %1604 }
 0xa19   :  { %v907_v14 = vsel %vm159_vm1, %v1605_v13, 0.0 }
 0xa1a   :  { %908 = vadd.xlane.f32.xlu1 %v907_v14  ;;  %v1120_v14 = vld [vmem:[%s2208_s16 + $0x8] sm:$0xff] }
 0xa1c   :  { %v1607_v16 = vpop.eup %1606 }
 0xa1d   :  { %v910_v19 = vsel %vm159_vm1, %v1607_v16, 0.0 }
 0xa1e   :  { %911 = vadd.xlane.f32.xlu1 %v910_v19 }
 0xaa3   :  { %v909_v20 = vpop.xlane.xlu1 %908 }
 0xaa4   :  { %1608 = vrcp.f32 %v909_v20 }
 0xaa7   :  { %v912_v21 = vpop.xlane.xlu1 %911 }
 0xaa8   :  { %1610 = vrcp.f32 %v912_v21 }
 0xab1   :  { %v1609_v22 = vpop.eup %1608 }
 0xab2   :  { %v914_v15 = vmul.f32 %v1609_v22, %v1605_v13  ;;  %v1119_v13 = vld [vmem:[%s2208_s16] sm:$0xff] }
 0xab4   :  { %v919_v31 = vmul.f32 %v917_v23, %v914_v15 }
 0xab5   :  { %v1611_v17 = vpop.eup %1610 }
 0xab6   :  { %v916_v28 = vmul.f32 %v1611_v17, %v1607_v16  ;;  %v1124_v16 = vpack.c.bf16 %v1120_v14, %v1119_v13 }
 0xab8   :  { %v920_v32 = vmul.f32 %v918_v24, %v916_v28 }
 0xaba   :  { %v921_v34 = vpack.c.bf16 %v920_v32, %v919_v31 }
 0xabc   :  { %1524 = vmatmul.mubr.msk.bf16.vlgmr.msra.gmra.mxu0 %vm159_vm1, %v921_v34 }
 0xabd   :  { %1536 = vmatpush3.bf16.msra.mxu0 %v977_v33  ;;  %1539 = vmatprep.mubr.msk.bf16.mxu0 %vm1781_vm0, %v1780_v2  ;;  %v1382_v33 = vld [vmem:[%s2209_s17] ss:$0 sm:$0xff] }
 0xabe   :  { %1537 = vmatprep.subr.bf16.mxu0 %v1780_v2 }
 0xac1   :  { %1538 = vmatpush3.bf16.msra.mxu0 %v976_v18 }
 0xac2   :  { %1551 = vmatprep.subr.bf16.mxu0 %v1780_v2 }
 0xac4   :  { %1540 = vmatmul.mubr.msk.bf16.vlgmr.msra.gmra.mxu0 %vm218_vm2, %v2069_v27  ;;  %v979_v27 = vld [vmem:[%s2207_s14 + $0x8] sm:$0xff] }
 0xac5   :  { %1553 = vmatprep.mubr.msk.bf16.mxu0 %vm1781_vm0, %v1780_v2  ;;  %v983_v41 = vpack.c.bf16 %v979_v27, %v978_v40  ;;  %v1239_v40 = vpack.c.bf16 %v1236_v39, %v1235_v38  ;;  %v1233_v27 = vld [vmem:[#allocation16] sm:$0xff] }
 0xac7   :  { %1530 = vmatpush3.bf16.msra.mxu1 %v983_v41  ;;  %v1234_v41 = vld [vmem:[#allocation16 + $0x8] sm:$0xff] }
 0xac8   :  { %1543 = vmatprep.subr.bf16.mxu1 %v1780_v2 }
 0xb7c   :  { %v959_v42 = vpop.f32.mrf.mxu0 }
 0xb7d   :  { %v966_v43 = vmax.f32 %v959_v42, 0.0  ;;  %v1238_v42 = vpack.c.bf16 %v1234_v41, %v1233_v27 }
 0xb7e   :  { %v1525_v44 = vpop.f32.mrf.mxu0 }
 0xb7f   :  { %968 = vst.msk [vmem:[#allocation4] sm:$0xff] %vm218_vm2, %v966_v43 }
 0xb80   :  { %v962_v46 = vpop.f32.mrf.mxu0 }
 0xb81   :  { %v967_v47 = vmax.f32 %v962_v46, 0.0 }
 0xb82   :  { %v1526_v48 = vpop.f32.mrf.mxu0 }
 0xb83   :  { %969 = vst.msk [vmem:[#allocation4 + $0x8] sm:$0xff] %vm218_vm2, %v967_v47 }
 0xb84   :  { %v1063_v49 = vpop.f32.mrf.mxu0 }
 0xb86   :  { %v1541_v50 = vpop.f32.mrf.mxu0  ;;  %v970_v53 = vld [vmem:[#allocation4] sm:$0xff] }
 0xb88   :  { %v1066_v51 = vpop.f32.mrf.mxu0 }
 0xb8a   :  { %v1542_v52 = vpop.f32.mrf.mxu0  ;;  %v971_v54 = vld [vmem:[#allocation4 + $0x8] sm:$0xff] }
 0xb8b   :  { %v982_v55 = vpack.c.bf16 %v971_v54, %v970_v53 }
 0xb8d   :  { %1532 = vmatmul.mubr.msk.bf16.vlgmr.msra.gmra.mxu1 %vm218_vm2, %v982_v55 }
 0xb8e   :  { %1547 = vmatprep.mubr.msk.bf16.mxu1 %vm1781_vm0, %v1780_v2  ;;  %1544 = vmatpush3.bf16.msra.mxu1 %v1125_v10 }
 0xb8f   :  { %1545 = vmatprep.subr.bf16.mxu1 %v1780_v2 }
 0xb92   :  { %1546 = vmatpush3.bf16.msra.mxu1 %v1124_v16 }
 0xb93   :  { %1557 = vmatprep.subr.bf16.mxu1 %v1780_v2 }
 0xc4d   :  { %v1022_v56 = vpop.f32.mrf.mxu1 }
 0xc4e   :  { %v1064_v58 = vadd.f32 %v1063_v49, %v1022_v56 }
 0xc4f   :  { %v1533_v59 = vpop.f32.mrf.mxu1 }
 0xc50   :  { %v1077_v60 = vadd.f32 %v1379_v57, %v1064_v58 }
 0xc51   :  { %v1025_v61 = vpop.f32.mrf.mxu1 }
 0xc52   :  { %v1380_v62 = vmul.f32 -1.442695, %v1077_v60  ;;  %v1067_v63 = vadd.f32 %v1066_v51, %v1025_v61 }
 0xc53   :  { %v1534_v0 = vpop.f32.mrf.mxu1 }
 0xc54   :  { %1612 = vpow2.f32 %v1380_v62  ;;  %v1078_v1 = vadd.f32 %v1379_v57, %v1067_v63 }
 0xc56   :  { %v1381_v3 = vmul.f32 -1.442695, %v1078_v1 }
 0xc58   :  { %1614 = vpow2.f32 %v1381_v3 }
 0xc61   :  { %v1613_v4 = vpop.eup %1612 }
 0xc62   :  { %v1085_v5 = vadd.f32 1.0, %v1613_v4 }
 0xc64   :  { %1616 = vrcp.f32 %v1085_v5 }
 0xc65   :  { %v1615_v6 = vpop.eup %1614 }
 0xc66   :  { %v1086_v7 = vadd.f32 1.0, %v1615_v6 }
 0xc68   :  { %1618 = vrcp.f32 %v1086_v7 }
 0xc71   :  { %v1617_v8 = vpop.eup %1616 }
 0xc72   :  { %1093 = vperm.xlu1 %1586, %v1617_v8   ;;  %v1103_v11 = vsub.f32 1.0, %v1617_v8 }
 0xc75   :  { %v1619_v12 = vpop.eup %1618 }
 0xc76   :  { %1107 = vperm.xlu1 %1586, %v1103_v11   ;;  %1098 = vperm.xlu0 %1585, %v1619_v12   ;;  %v1104_v19 = vsub.f32 1.0, %v1619_v12 }
 0xc7a   :  { %1112 = vperm.xlu1 %1586, %v1104_v19  }
 0xced   :  { %v1094_v20 = vpop.permute.xlu1 %1093 }
 0xcee   :  { %v1101_v15 = vmul.f32 %v1094_v20, %v2063_v25 }
 0xcf1   :  { %v1108_v21 = vpop.permute.xlu1 %1107  ;;  %v1099_v22 = vpop.permute.xlu0 %1098 }
 0xcf2   :  { %v1115_v23 = vmul.f32 %v1108_v21, %v970_v53  ;;  %v1102_v17 = vmul.f32 %v1099_v22, %v2065_v26 }
 0xcf4   :  { %v1117_v29 = vadd.f32 %v1115_v23, %v1101_v15 }
 0xcf5   :  { %v1113_v24 = vpop.permute.xlu1 %1112 }
 0xcf6   :  { %v1116_v28 = vmul.f32 %v1113_v24, %v971_v54 }
 0xcf8   :  { %v1118_v30 = vadd.f32 %v1116_v28, %v1102_v17 }
 0xcfa   :  { %v1123_v31 = vpack.c.bf16 %v1118_v30, %v1117_v29 }
 0xcfc   :  { %1548 = vmatmul.mubr.msk.bf16.vlgmr.msra.gmra.mxu1 %vm218_vm2, %v1123_v31 }
 0xcfd   :  { %1561 = vmatprep.mubr.msk.bf16.mxu1 %vm1781_vm0, %v1780_v2  ;;  %1558 = vmatpush3.bf16.msra.mxu1 %v1239_v40 }
 0xcfe   :  { %1559 = vmatprep.subr.bf16.mxu1 %v1780_v2 }
 0xd01   :  { %1560 = vmatpush3.bf16.msra.mxu1 %v1238_v42 }
 0xdbc   :  { %v1170_v32 = vpop.f32.mrf.mxu1 }
 0xdbd   :  { %v1171_v36 = vadd.f32 %v1382_v33, %v1170_v32 }
 0xdbe   :  { %v1549_v34 = vpop.f32.mrf.mxu1 }
 0xdc0   :  { %v1173_v35 = vpop.f32.mrf.mxu1 }
 0xdc1   :  { %v1174_v25 = vadd.f32 %v1382_v33, %v1173_v35 }
 0xdc2   :  { %v1550_v18 = vpop.f32.mrf.mxu1 }
 0xdc3   :  { %v1179_v26 = vpack.c.bf16 %v1174_v25, %v1171_v36 }
 0xdc5   :  { %1552 = vmatpush3.bf16.msra.mxu0 %v1179_v26 }
 0xdc6   :  { %1565 = vmatprep.subr.bf16.mxu0 %v1780_v2 }
 0xdc8   :  { %1554 = vmatmul.mubr.msk.bf16.vlgmr.msra.gmra.mxu0 %vm159_vm1, %v1587_v37 }
 0xdc9   :  { %1567 = vmatprep.mubr.msk.bf16.mxu0 %vm1781_vm0, %v1780_v2  ;;  %v1386_v2 = vld [vmem:[%s2211_s19] ss:$0 sm:$0xff]  ;;  %s1740_s19 = scalar_lea.vmem %s1345_s3, 256 }
 0xdca   :  { %p1741_p2 = scmp.ne.s32.totalorder %s1345_s3, %s1740_s19  ;;  %p1746_p4 = scmp.lt.s32.totalorder %s1740_s19, %s1740_s19 }
 0xdcc   :  { %p1747_p5 = por %p1746_p4, %p1745_p3 }
 0xdce   :  { %p1748_p6 = pnand %p1747_p5, %p1741_p2 }
 0xe88   :  { %v1222_v43 = vpop.f32.mrf.mxu0 }
 0xe89   :  { %v1229_v46 = vmax.f32 %v1222_v43, 0.0 }
 0xe8a   :  { %v1555_v44 = vpop.f32.mrf.mxu0 }
 0xe8b   :  { %v1231_v50 = vadd.f32 %v1229_v46, %v1117_v29 }
 0xe8c   :  { %v1225_v47 = vpop.f32.mrf.mxu0 }
 0xe8d   :  { %v1230_v48 = vmax.f32 %v1225_v47, 0.0 }
 0xe8e   :  { %v1556_v49 = vpop.f32.mrf.mxu0 }
 0xe8f   :  { %v1232_v51 = vadd.f32 %v1230_v48, %v1118_v30 }
 0xe91   :  { %v1237_v52 = vpack.c.bf16 %v1232_v51, %v1231_v50 }
 0xe93   :  { %1562 = vmatmul.mubr.msk.bf16.vlgmr.msra.gmra.mxu1 %vm218_vm2, %v1237_v52 }
 0xf53   :  { %v1284_v53 = vpop.f32.mrf.mxu1 }
 0xf54   :  { %v1285_v56 = vadd.f32 %v1386_v2, %v1284_v53 }
 0xf55   :  { %v1563_v54 = vpop.f32.mrf.mxu1 }
 0xf57   :  { %v1287_v55 = vpop.f32.mrf.mxu1 }
 0xf58   :  { %v1288_v57 = vadd.f32 %v1386_v2, %v1287_v55 }
 0xf59   :  { %v1564_v58 = vpop.f32.mrf.mxu1 }
 0xf5a   :  { %v1291_v59 = vpack.c.bf16 %v1288_v57, %v1285_v56 }
 0xf5c   :  { %1566 = vmatpush3.bf16.msra.mxu0 %v1291_v59 }
 0xf5f   :  { %1568 = vmatmul.mubr.msk.bf16.vlgmr.msra.gmra.mxu0 %vm159_vm1, %v1587_v37 }
0x101f   :  { %v1326_v60 = vpop.f32.mrf.mxu0 }
0x1020   :  { %v1333_v61 = vmax.f32 %v1326_v60, 0.0 }
0x1021   :  { %v1569_v62 = vpop.f32.mrf.mxu0 }
0x1022   :  { %v1335_v63 = vadd.f32 %v1333_v61, %v1231_v50 }
0x1023   :  { %v1329_v0 = vpop.f32.mrf.mxu0 }
0x1024   :  { %1337 = vst.msk [vmem:[#allocation18] sm:$0xff] %vm218_vm2, %v1335_v63  ;;  %v1334_v1 = vmax.f32 %v1329_v0, 0.0 }
0x1025   :  { %v1570_v3 = vpop.f32.mrf.mxu0 }
0x1026   :  { %v1336_v4 = vadd.f32 %v1334_v1, %v1232_v51 }
0x1028   :  { %1338 = vst.msk [vmem:[#allocation18 + $0x8] sm:$0xff] %vm218_vm2, %v1336_v4 }
0x1029   :  { %1751 = shalt.err (!%p1748_p6)
}
0x102a   :  { %1350 = dma.vmem_to_hbm [thread:$0]  %s1345_s3, 256, %s2212_s20, [#allocation9], %s1775_s1, %s1775_s1, %s1776_s22  }
0x102b   :  { %1768 = dma.done.wait [#allocation9], 256  }
0x102c   :  { %1769 = vsyncadd [#allocation9], 4294967040 }
0x102d   :  { %1354 = vsyncpa [#allocation8], 1 }
0x102e   :  { %1355 = vsyncpa [#allocation11], 1 }
0x102f   :  { %1356 = vsyncpa [#allocation14], 1 }
0x1030   :  { %1357 = vsyncpa [#allocation17], 1 }
0x1031   :  { %1358 = vsyncpa [#allocation9], 1 }

</bundles_post_ra>
